<compile_context>
chip_gen: v7x
topology: tpu7x:2x2x1
jax: 0.10.0
libtpu: 0.0.40
codegen_flags: <defaults>
</compile_context>

<pallas_src>
import jax
import jax.numpy as jnp
from jax.experimental import pallas as pl
from jax.experimental.pallas import tpu as pltpu

# --- scaled-down hyperparameters (original: SEQ=422, vocab=7500, E=H=128, C=74) ---
SEQ_SIZE = 8          # scaled from 422  (LSTM "batch" axis B; batch_first=False)
EMB_DIM = 128
LSTM_DIM = 128
NUM_EMBEDDINGS = 256  # scaled from 7500
NUM_CLASSES = 74
CLASS_PAD = 128       # lane-dense head output (sliced back to 74 in the wrapper)
BATCH = 2             # N samples; the LSTM recurrence runs over this axis (time T)


# ---------------------------------------------------------------------------
# Fused kernel: embedding gather + 2-layer LSTM recurrence + Flatten + Linear + softmax
# ---------------------------------------------------------------------------
def net_kernel(ids_ref, emb_ref, wih1_ref, b1_ref, wbig_ref, b2_ref,
               wfc_ref, bfc_ref, out_ref):
    H = LSTM_DIM
    T = out_ref.shape[0]                 # time axis == N samples (batch_first=False)
    B = wfc_ref.shape[0] // H            # LSTM batch axis == SEQ_SIZE

    # ---- In-kernel embedding gather --------------------------------------
    # Token ids sit in SMEM; each id drives a dynamic (1, E) row slice of the
    # VMEM-resident table (f32 rows: safe 32-bit dynamic-sublane path), then a
    # single bf16 cast feeds the MXU.  Removes the separate XLA gather+cast op
    # and the HBM round-trip of the embedded activations.
    rows = [emb_ref[pl.ds(ids_ref[r], 1), :] for r in range(T * B)]
    emb = jnp.concatenate(rows, axis=0).astype(jnp.bfloat16)   # (T*B, E) time-major

    # Layer-1 input projection hoisted out of the recurrence: one large MXU matmul
    # over all (t, b) rows instead of T tiny ones inside the serial loop.
    gates1_pre = jnp.dot(emb, wih1_ref[...],
                         preferred_element_type=jnp.float32) + b1_ref[...]
    # Hoist the layer-2 bias broadcast out of the loop (JAX does not CSE it).
    b2b = jnp.broadcast_to(b2_ref[...], (B, 4 * H))

    def sig(x):
        # sigmoid(x) = 0.5*tanh(0.5 x) + 0.5 -> one EUP op (tanh) instead of exp+recip;
        # the extra mul/add ride free in the 4 VALU slots.
        return 0.5 * jnp.tanh(0.5 * x) + 0.5

    def gates_to_hc(g, c_prev):
        # PyTorch LSTM gate order i | f | g | o; elementwise math kept in f32.
        i = sig(g[:, 0 * H:1 * H])
        f = sig(g[:, 1 * H:2 * H])
        gg = jnp.tanh(g[:, 2 * H:3 * H])
        o = sig(g[:, 3 * H:4 * H])
        c = f * c_prev + i * gg
        h = o * jnp.tanh(c)
        return h, c

    c1 = c2 = h2 = jnp.zeros((B, H), jnp.float32)
    g1_rec = None                        # h1 @ W_hh1 term, produced one step early
    h2_steps = []                        # register-resident layer-2 states (no scratch)

    # Fully-unrolled recurrence over the short time axis (T == N samples).
    # TODO(synk): switch to lax.fori_loop(..., unroll=k) with carried (h1,c1,h2,c2,g1_rec)
    # if T grows beyond a handful (static unroll does not bound vreg live ranges).
    for t in range(T):
        # Layer 1: the recurrent h1 @ W_hh1 contribution was already produced by the
        # previous step's fused matmul (g1_rec); nothing recurrent at t == 0.
        g1 = gates1_pre[t * B:(t + 1) * B, :]
        if g1_rec is not None:
            g1 = g1 + g1_rec
        h1, c1 = gates_to_hc(g1, c1)

        # One fused (B, 2H) x (2H, 8H) MXU matmul per step:
        #   cols 0:4H  -> layer-2 gates g2(t)            ([h1 ; h2_prev] @ [W_ih2 ; W_hh2])
        #   cols 4H:8H -> next step's layer-1 recurrence (h1 @ W_hh1)
        # Halves the serial MXU rounds per step; the extra output columns are free
        # because M = B = 8 leaves the MXU rows nearly empty.
        # (nn.LSTM inter-layer dropout p=0.2 is train-only; eval forward is identity.)
        if t == 0:                        # h2_prev == 0: only the top (H, 8H) half matters
            fused = jnp.dot(h1.astype(jnp.bfloat16), wbig_ref[:H, :],
                            preferred_element_type=jnp.float32)
        else:
            xh = jnp.concatenate([h1, h2], axis=1).astype(jnp.bfloat16)
            fused = jnp.dot(xh, wbig_ref[...], preferred_element_type=jnp.float32)
        g1_rec = fused[:, 4 * H:]
        h2, c2 = gates_to_hc(fused[:, :4 * H] + b2b, c2)
        h2_steps.append(h2)

    # ---- Fused head -------------------------------------------------------
    # nn.Flatten: flat[t, s*H + h] = h2(t)[s, h]  ==  per-step (B, H) -> (1, B*H) reshape.
    # Register-resident states + one relayout per step replace the previous strided
    # scratch gather (8 masked sub-vreg loads + 8-way lane concat).
    flat = jnp.concatenate([h.reshape(1, B * H) for h in h2_steps], axis=0)
    logits = jnp.dot(flat.astype(jnp.bfloat16), wfc_ref[...],
                     preferred_element_type=jnp.float32) + bfc_ref[...]
    # Padded classes carry a -1e30 bias -> exp underflows to exactly 0 probability.
    m = jnp.max(logits, axis=1, keepdims=True)
    e = jnp.exp(logits - m)
    # Exact divide (negligible cost at (T, 128)); rows sum to 1 like torch.softmax.
    out_ref[...] = e / jnp.sum(e, axis=1, keepdims=True)


def net_fused_pallas(x_ids, params):
    vmem = pl.BlockSpec(memory_space=pltpu.MemorySpace.VMEM)
    smem = pl.BlockSpec(memory_space=pltpu.MemorySpace.SMEM)
    # Footprint here is <1 MiB.  When scaling back to SEQ=422 / vocab=7500 (head weight
    # ~13 MiB bf16), set pltpu.CompilerParams(vmem_limit_bytes=...) and/or tile w_fc with
    # a grid — v7x has only 64 MiB physical VMEM (32 MiB scoped default).
    return pl.pallas_call(
        net_kernel,
        out_shape=jax.ShapeDtypeStruct((BATCH, CLASS_PAD), jnp.float32),
        in_specs=[smem] + [vmem] * 7,
        out_specs=vmem,
    )(x_ids.reshape(-1).astype(jnp.int32),          # (N*S,) time-major token ids -> SMEM
      params["embedding"], params["w_ih1"], params["b1"],
      params["w_big2"], params["b2"], params["w_fc"], params["b_fc"])


# ---------------------------------------------------------------------------
# Full forward pass (single kernel launch; only lane un-padding stays outside)
# ---------------------------------------------------------------------------
def net_forward(x_ids, params):
    # nn.Dropout(p=0.4) and the LSTM inter-layer dropout (p=0.2) are identity in eval mode.
    probs_pad = net_fused_pallas(x_ids, params)     # (N, 128)
    return probs_pad[:, :NUM_CLASSES]               # (N, C) probabilities


# ---------------------------------------------------------------------------
# Deterministic parameter initialization (shapes from Net.__init__), packed
# into the kernel layout (fused per-step weight, lane-padded head).
# ---------------------------------------------------------------------------
def init_params(key):
    ks = jax.random.split(key, 9)
    E, H = EMB_DIM, LSTM_DIM
    s = 1.0 / jnp.sqrt(jnp.float32(H))

    emb = jax.random.normal(ks[0], (NUM_EMBEDDINGS, E), jnp.float32)
    emb = emb.at[0].set(0.0)  # padding_idx=0

    def u(k, shape):
        return jax.random.uniform(k, shape, jnp.float32, -s, s)

    w_ih1 = u(ks[1], (E, 4 * H))          # layer-1 input weights, pre-transposed (E, 4H)
    w_hh1 = u(ks[2], (H, 4 * H))
    b1 = u(ks[3], (1, 4 * H))             # NOTE: real PyTorch packing is b_ih + b_hh
    w_ih2 = u(ks[4], (H, 4 * H))
    w_hh2 = u(ks[5], (H, 4 * H))
    b2 = u(ks[6], (1, 4 * H))
    w_fc = u(ks[7], (SEQ_SIZE * H, NUM_CLASSES))
    b_fc = u(ks[8], (1, NUM_CLASSES))

    # Fused per-step weight: [h1_t ; h2_{t-1}] @ [[W_ih2, W_hh1], [W_hh2, 0]]  -> (2H, 8H).
    # Cols 0:4H give the layer-2 gates; cols 4H:8H give h1 @ W_hh1 for the NEXT step.
    w_big2 = jnp.zeros((2 * H, 8 * H), jnp.float32)
    w_big2 = w_big2.at[:H, :4 * H].set(w_ih2)
    w_big2 = w_big2.at[H:, :4 * H].set(w_hh2)
    w_big2 = w_big2.at[:H, 4 * H:].set(w_hh1)

    # Lane-pad the class dim to 128 (unmasked lane-dense head store); padded bias of
    # -1e30 makes the padded logits contribute exactly zero probability after softmax.
    w_fc_pad = jnp.zeros((SEQ_SIZE * H, CLASS_PAD), jnp.float32).at[:, :NUM_CLASSES].set(w_fc)
    b_fc_pad = jnp.full((1, CLASS_PAD), -1e30, jnp.float32).at[:, :NUM_CLASSES].set(b_fc)

    return dict(
        embedding=emb,                        # f32 rows: 32-bit dynamic gather in-kernel
        w_ih1=w_ih1.astype(jnp.bfloat16),     # MXU operands in bf16, accumulation f32
        b1=b1,
        w_big2=w_big2.astype(jnp.bfloat16),
        b2=b2,
        w_fc=w_fc_pad.astype(jnp.bfloat16),
        b_fc=b_fc_pad,
    )


if __name__ == "__main__":
    key = jax.random.PRNGKey(0)
    pkey, xkey = jax.random.split(key)
    params = init_params(pkey)
    x = jax.random.randint(xkey, (BATCH, SEQ_SIZE), 0, NUM_EMBEDDINGS, dtype=jnp.int32)

    out = jax.jit(net_forward)(x, params)
    out = jax.block_until_ready(out)

    assert out.shape == (BATCH, NUM_CLASSES), out.shape
    assert bool(jnp.all(jnp.isfinite(out)))
    assert bool(jnp.allclose(jnp.sum(out, axis=1), 1.0, atol=1e-3))
    print("KERNEL_OK")
</pallas_src>

<mosaic_0001>
module attributes {stable_mosaic.version = 11 : i64} {
  func.func @net_kernel(%arg0: memref<16xi32, #tpu.memory_space<smem>>, %arg1: memref<256x128xf32, #tpu.memory_space<vmem>>, %arg2: memref<128x512xbf16, #tpu.memory_space<vmem>>, %arg3: memref<1x512xf32, #tpu.memory_space<vmem>>, %arg4: memref<256x1024xbf16, #tpu.memory_space<vmem>>, %arg5: memref<1x512xf32, #tpu.memory_space<vmem>>, %arg6: memref<1024x128xbf16, #tpu.memory_space<vmem>>, %arg7: memref<1x128xf32, #tpu.memory_space<vmem>>, %arg8: memref<2x128xf32, #tpu.memory_space<vmem>>) attributes {dimension_semantics = [], scalar_prefetch = 0 : i64, scratch_operands = 0 : i64, tpu.core_type = #tpu.core_type<tc>} {
    %c0 = arith.constant 0 : index
    %0 = memref.load %arg0[%c0] : memref<16xi32, #tpu.memory_space<smem>>
    %1 = arith.index_cast %0 : i32 to index
    %c0_0 = arith.constant 0 : index
    %2 = vector.load %arg1[%1, %c0_0] : memref<256x128xf32, #tpu.memory_space<vmem>>, vector<1x128xf32>
    %c1 = arith.constant 1 : index
    %3 = memref.load %arg0[%c1] : memref<16xi32, #tpu.memory_space<smem>>
    %4 = arith.index_cast %3 : i32 to index
    %c0_1 = arith.constant 0 : index
    %5 = vector.load %arg1[%4, %c0_1] : memref<256x128xf32, #tpu.memory_space<vmem>>, vector<1x128xf32>
    %c2 = arith.constant 2 : index
    %6 = memref.load %arg0[%c2] : memref<16xi32, #tpu.memory_space<smem>>
    %7 = arith.index_cast %6 : i32 to index
    %c0_2 = arith.constant 0 : index
    %8 = vector.load %arg1[%7, %c0_2] : memref<256x128xf32, #tpu.memory_space<vmem>>, vector<1x128xf32>
    %c3 = arith.constant 3 : index
    %9 = memref.load %arg0[%c3] : memref<16xi32, #tpu.memory_space<smem>>
    %10 = arith.index_cast %9 : i32 to index
    %c0_3 = arith.constant 0 : index
    %11 = vector.load %arg1[%10, %c0_3] : memref<256x128xf32, #tpu.memory_space<vmem>>, vector<1x128xf32>
    %c4 = arith.constant 4 : index
    %12 = memref.load %arg0[%c4] : memref<16xi32, #tpu.memory_space<smem>>
    %13 = arith.index_cast %12 : i32 to index
    %c0_4 = arith.constant 0 : index
    %14 = vector.load %arg1[%13, %c0_4] : memref<256x128xf32, #tpu.memory_space<vmem>>, vector<1x128xf32>
    %c5 = arith.constant 5 : index
    %15 = memref.load %arg0[%c5] : memref<16xi32, #tpu.memory_space<smem>>
    %16 = arith.index_cast %15 : i32 to index
    %c0_5 = arith.constant 0 : index
    %17 = vector.load %arg1[%16, %c0_5] : memref<256x128xf32, #tpu.memory_space<vmem>>, vector<1x128xf32>
    %c6 = arith.constant 6 : index
    %18 = memref.load %arg0[%c6] : memref<16xi32, #tpu.memory_space<smem>>
    %19 = arith.index_cast %18 : i32 to index
    %c0_6 = arith.constant 0 : index
    %20 = vector.load %arg1[%19, %c0_6] : memref<256x128xf32, #tpu.memory_space<vmem>>, vector<1x128xf32>
    %c7 = arith.constant 7 : index
    %21 = memref.load %arg0[%c7] : memref<16xi32, #tpu.memory_space<smem>>
    %22 = arith.index_cast %21 : i32 to index
    %c0_7 = arith.constant 0 : index
    %23 = vector.load %arg1[%22, %c0_7] : memref<256x128xf32, #tpu.memory_space<vmem>>, vector<1x128xf32>
    %c8 = arith.constant 8 : index
    %24 = memref.load %arg0[%c8] : memref<16xi32, #tpu.memory_space<smem>>
    %25 = arith.index_cast %24 : i32 to index
    %c0_8 = arith.constant 0 : index
    %26 = vector.load %arg1[%25, %c0_8] : memref<256x128xf32, #tpu.memory_space<vmem>>, vector<1x128xf32>
    %c9 = arith.constant 9 : index
    %27 = memref.load %arg0[%c9] : memref<16xi32, #tpu.memory_space<smem>>
    %28 = arith.index_cast %27 : i32 to index
    %c0_9 = arith.constant 0 : index
    %29 = vector.load %arg1[%28, %c0_9] : memref<256x128xf32, #tpu.memory_space<vmem>>, vector<1x128xf32>
    %c10 = arith.constant 10 : index
    %30 = memref.load %arg0[%c10] : memref<16xi32, #tpu.memory_space<smem>>
    %31 = arith.index_cast %30 : i32 to index
    %c0_10 = arith.constant 0 : index
    %32 = vector.load %arg1[%31, %c0_10] : memref<256x128xf32, #tpu.memory_space<vmem>>, vector<1x128xf32>
    %c11 = arith.constant 11 : index
    %33 = memref.load %arg0[%c11] : memref<16xi32, #tpu.memory_space<smem>>
    %34 = arith.index_cast %33 : i32 to index
    %c0_11 = arith.constant 0 : index
    %35 = vector.load %arg1[%34, %c0_11] : memref<256x128xf32, #tpu.memory_space<vmem>>, vector<1x128xf32>
    %c12 = arith.constant 12 : index
    %36 = memref.load %arg0[%c12] : memref<16xi32, #tpu.memory_space<smem>>
    %37 = arith.index_cast %36 : i32 to index
    %c0_12 = arith.constant 0 : index
    %38 = vector.load %arg1[%37, %c0_12] : memref<256x128xf32, #tpu.memory_space<vmem>>, vector<1x128xf32>
    %c13 = arith.constant 13 : index
    %39 = memref.load %arg0[%c13] : memref<16xi32, #tpu.memory_space<smem>>
    %40 = arith.index_cast %39 : i32 to index
    %c0_13 = arith.constant 0 : index
    %41 = vector.load %arg1[%40, %c0_13] : memref<256x128xf32, #tpu.memory_space<vmem>>, vector<1x128xf32>
    %c14 = arith.constant 14 : index
    %42 = memref.load %arg0[%c14] : memref<16xi32, #tpu.memory_space<smem>>
    %43 = arith.index_cast %42 : i32 to index
    %c0_14 = arith.constant 0 : index
    %44 = vector.load %arg1[%43, %c0_14] : memref<256x128xf32, #tpu.memory_space<vmem>>, vector<1x128xf32>
    %c15 = arith.constant 15 : index
    %45 = memref.load %arg0[%c15] : memref<16xi32, #tpu.memory_space<smem>>
    %46 = arith.index_cast %45 : i32 to index
    %c0_15 = arith.constant 0 : index
    %47 = vector.load %arg1[%46, %c0_15] : memref<256x128xf32, #tpu.memory_space<vmem>>, vector<1x128xf32>
    %48 = tpu.concatenate %2, %5, %8, %11, %14, %17, %20, %23, %26, %29, %32, %35, %38, %41, %44, %47 in 0 : vector<1x128xf32>, vector<1x128xf32>, vector<1x128xf32>, vector<1x128xf32>, vector<1x128xf32>, vector<1x128xf32>, vector<1x128xf32>, vector<1x128xf32>, vector<1x128xf32>, vector<1x128xf32>, vector<1x128xf32>, vector<1x128xf32>, vector<1x128xf32>, vector<1x128xf32>, vector<1x128xf32>, vector<1x128xf32> -> vector<16x128xf32>
    %49 = arith.truncf %48 : vector<16x128xf32> to vector<16x128xbf16>
    %c0_16 = arith.constant 0 : index
    %c0_17 = arith.constant 0 : index
    %50 = vector.load %arg2[%c0_16, %c0_17] : memref<128x512xbf16, #tpu.memory_space<vmem>>, vector<128x512xbf16>
    %cst = arith.constant dense<0.000000e+00> : vector<16x512xf32>
    %51 = tpu.matmul %49, %50, %cst {dimension_numbers = #tpu.dot_dimension_numbers<[1], [0], [0], [1], [0, 0, 1, 1], [], []>} : vector<16x128xbf16>, vector<128x512xbf16>, vector<16x512xf32> -> vector<16x512xf32>
    %c0_18 = arith.constant 0 : index
    %c0_19 = arith.constant 0 : index
    %52 = vector.load %arg3[%c0_18, %c0_19] : memref<1x512xf32, #tpu.memory_space<vmem>>, vector<1x512xf32>
    %53 = vector.broadcast %52 : vector<1x512xf32> to vector<16x512xf32>
    %54 = arith.addf %51, %53 : vector<16x512xf32>
    %c0_20 = arith.constant 0 : index
    %c0_21 = arith.constant 0 : index
    %55 = vector.load %arg5[%c0_20, %c0_21] : memref<1x512xf32, #tpu.memory_space<vmem>>, vector<1x512xf32>
    %56 = vector.shape_cast %55 : vector<1x512xf32> to vector<1x512xf32>
    %57 = vector.broadcast %56 : vector<1x512xf32> to vector<8x512xf32>
    %cst_22 = arith.constant 0.000000e+00 : f32
    %58 = vector.broadcast %cst_22 : f32 to vector<8x128xf32>
    %59 = vector.extract_strided_slice %54 {offsets = [0, 0], sizes = [8, 512], strides = [1, 1]} : vector<16x512xf32> to vector<8x512xf32>
    %60 = vector.extract_strided_slice %59 {offsets = [0, 0], sizes = [8, 128], strides = [1, 1]} : vector<8x512xf32> to vector<8x128xf32>
    %cst_23 = arith.constant 5.000000e-01 : f32
    %61 = vector.broadcast %cst_23 : f32 to vector<8x128xf32>
    %62 = arith.mulf %61, %60 : vector<8x128xf32>
    %63 = math.tanh %62 : vector<8x128xf32>
    %cst_24 = arith.constant 5.000000e-01 : f32
    %64 = vector.broadcast %cst_24 : f32 to vector<8x128xf32>
    %65 = arith.mulf %64, %63 : vector<8x128xf32>
    %cst_25 = arith.constant 5.000000e-01 : f32
    %66 = vector.broadcast %cst_25 : f32 to vector<8x128xf32>
    %67 = arith.addf %65, %66 : vector<8x128xf32>
    %68 = vector.extract_strided_slice %59 {offsets = [0, 128], sizes = [8, 128], strides = [1, 1]} : vector<8x512xf32> to vector<8x128xf32>
    %cst_26 = arith.constant 5.000000e-01 : f32
    %69 = vector.broadcast %cst_26 : f32 to vector<8x128xf32>
    %70 = arith.mulf %69, %68 : vector<8x128xf32>
    %71 = math.tanh %70 : vector<8x128xf32>
    %cst_27 = arith.constant 5.000000e-01 : f32
    %72 = vector.broadcast %cst_27 : f32 to vector<8x128xf32>
    %73 = arith.mulf %72, %71 : vector<8x128xf32>
    %cst_28 = arith.constant 5.000000e-01 : f32
    %74 = vector.broadcast %cst_28 : f32 to vector<8x128xf32>
    %75 = arith.addf %73, %74 : vector<8x128xf32>
    %76 = vector.extract_strided_slice %59 {offsets = [0, 256], sizes = [8, 128], strides = [1, 1]} : vector<8x512xf32> to vector<8x128xf32>
    %77 = math.tanh %76 : vector<8x128xf32>
    %78 = vector.extract_strided_slice %59 {offsets = [0, 384], sizes = [8, 128], strides = [1, 1]} : vector<8x512xf32> to vector<8x128xf32>
    %cst_29 = arith.constant 5.000000e-01 : f32
    %79 = vector.broadcast %cst_29 : f32 to vector<8x128xf32>
    %80 = arith.mulf %79, %78 : vector<8x128xf32>
    %81 = math.tanh %80 : vector<8x128xf32>
    %cst_30 = arith.constant 5.000000e-01 : f32
    %82 = vector.broadcast %cst_30 : f32 to vector<8x128xf32>
    %83 = arith.mulf %82, %81 : vector<8x128xf32>
    %cst_31 = arith.constant 5.000000e-01 : f32
    %84 = vector.broadcast %cst_31 : f32 to vector<8x128xf32>
    %85 = arith.addf %83, %84 : vector<8x128xf32>
    %86 = arith.mulf %75, %58 : vector<8x128xf32>
    %87 = arith.mulf %67, %77 : vector<8x128xf32>
    %88 = arith.addf %86, %87 : vector<8x128xf32>
    %89 = math.tanh %88 : vector<8x128xf32>
    %90 = arith.mulf %85, %89 : vector<8x128xf32>
    %91 = arith.truncf %90 : vector<8x128xf32> to vector<8x128xbf16>
    %c0_32 = arith.constant 0 : index
    %c0_33 = arith.constant 0 : index
    %92 = vector.load %arg4[%c0_32, %c0_33] : memref<256x1024xbf16, #tpu.memory_space<vmem>>, vector<128x1024xbf16>
    %cst_34 = arith.constant dense<0.000000e+00> : vector<8x1024xf32>
    %93 = tpu.matmul %91, %92, %cst_34 {dimension_numbers = #tpu.dot_dimension_numbers<[1], [0], [0], [1], [0, 0, 1, 1], [], []>} : vector<8x128xbf16>, vector<128x1024xbf16>, vector<8x1024xf32> -> vector<8x1024xf32>
    %94 = vector.extract_strided_slice %93 {offsets = [0, 512], sizes = [8, 512], strides = [1, 1]} : vector<8x1024xf32> to vector<8x512xf32>
    %95 = vector.extract_strided_slice %93 {offsets = [0, 0], sizes = [8, 512], strides = [1, 1]} : vector<8x1024xf32> to vector<8x512xf32>
    %96 = arith.addf %95, %57 : vector<8x512xf32>
    %97 = vector.extract_strided_slice %96 {offsets = [0, 0], sizes = [8, 128], strides = [1, 1]} : vector<8x512xf32> to vector<8x128xf32>
    %cst_35 = arith.constant 5.000000e-01 : f32
    %98 = vector.broadcast %cst_35 : f32 to vector<8x128xf32>
    %99 = arith.mulf %98, %97 : vector<8x128xf32>
    %100 = math.tanh %99 : vector<8x128xf32>
    %cst_36 = arith.constant 5.000000e-01 : f32
    %101 = vector.broadcast %cst_36 : f32 to vector<8x128xf32>
    %102 = arith.mulf %101, %100 : vector<8x128xf32>
    %cst_37 = arith.constant 5.000000e-01 : f32
    %103 = vector.broadcast %cst_37 : f32 to vector<8x128xf32>
    %104 = arith.addf %102, %103 : vector<8x128xf32>
    %105 = vector.extract_strided_slice %96 {offsets = [0, 128], sizes = [8, 128], strides = [1, 1]} : vector<8x512xf32> to vector<8x128xf32>
    %cst_38 = arith.constant 5.000000e-01 : f32
    %106 = vector.broadcast %cst_38 : f32 to vector<8x128xf32>
    %107 = arith.mulf %106, %105 : vector<8x128xf32>
    %108 = math.tanh %107 : vector<8x128xf32>
    %cst_39 = arith.constant 5.000000e-01 : f32
    %109 = vector.broadcast %cst_39 : f32 to vector<8x128xf32>
    %110 = arith.mulf %109, %108 : vector<8x128xf32>
    %cst_40 = arith.constant 5.000000e-01 : f32
    %111 = vector.broadcast %cst_40 : f32 to vector<8x128xf32>
    %112 = arith.addf %110, %111 : vector<8x128xf32>
    %113 = vector.extract_strided_slice %96 {offsets = [0, 256], sizes = [8, 128], strides = [1, 1]} : vector<8x512xf32> to vector<8x128xf32>
    %114 = math.tanh %113 : vector<8x128xf32>
    %115 = vector.extract_strided_slice %96 {offsets = [0, 384], sizes = [8, 128], strides = [1, 1]} : vector<8x512xf32> to vector<8x128xf32>
    %cst_41 = arith.constant 5.000000e-01 : f32
    %116 = vector.broadcast %cst_41 : f32 to vector<8x128xf32>
    %117 = arith.mulf %116, %115 : vector<8x128xf32>
    %118 = math.tanh %117 : vector<8x128xf32>
    %cst_42 = arith.constant 5.000000e-01 : f32
    %119 = vector.broadcast %cst_42 : f32 to vector<8x128xf32>
    %120 = arith.mulf %119, %118 : vector<8x128xf32>
    %cst_43 = arith.constant 5.000000e-01 : f32
    %121 = vector.broadcast %cst_43 : f32 to vector<8x128xf32>
    %122 = arith.addf %120, %121 : vector<8x128xf32>
    %123 = arith.mulf %112, %58 : vector<8x128xf32>
    %124 = arith.mulf %104, %114 : vector<8x128xf32>
    %125 = arith.addf %123, %124 : vector<8x128xf32>
    %126 = math.tanh %125 : vector<8x128xf32>
    %127 = arith.mulf %122, %126 : vector<8x128xf32>
    %128 = vector.extract_strided_slice %54 {offsets = [8, 0], sizes = [8, 512], strides = [1, 1]} : vector<16x512xf32> to vector<8x512xf32>
    %129 = arith.addf %128, %94 : vector<8x512xf32>
    %130 = vector.extract_strided_slice %129 {offsets = [0, 0], sizes = [8, 128], strides = [1, 1]} : vector<8x512xf32> to vector<8x128xf32>
    %cst_44 = arith.constant 5.000000e-01 : f32
    %131 = vector.broadcast %cst_44 : f32 to vector<8x128xf32>
    %132 = arith.mulf %131, %130 : vector<8x128xf32>
    %133 = math.tanh %132 : vector<8x128xf32>
    %cst_45 = arith.constant 5.000000e-01 : f32
    %134 = vector.broadcast %cst_45 : f32 to vector<8x128xf32>
    %135 = arith.mulf %134, %133 : vector<8x128xf32>
    %cst_46 = arith.constant 5.000000e-01 : f32
    %136 = vector.broadcast %cst_46 : f32 to vector<8x128xf32>
    %137 = arith.addf %135, %136 : vector<8x128xf32>
    %138 = vector.extract_strided_slice %129 {offsets = [0, 128], sizes = [8, 128], strides = [1, 1]} : vector<8x512xf32> to vector<8x128xf32>
    %cst_47 = arith.constant 5.000000e-01 : f32
    %139 = vector.broadcast %cst_47 : f32 to vector<8x128xf32>
    %140 = arith.mulf %139, %138 : vector<8x128xf32>
    %141 = math.tanh %140 : vector<8x128xf32>
    %cst_48 = arith.constant 5.000000e-01 : f32
    %142 = vector.broadcast %cst_48 : f32 to vector<8x128xf32>
    %143 = arith.mulf %142, %141 : vector<8x128xf32>
    %cst_49 = arith.constant 5.000000e-01 : f32
    %144 = vector.broadcast %cst_49 : f32 to vector<8x128xf32>
    %145 = arith.addf %143, %144 : vector<8x128xf32>
    %146 = vector.extract_strided_slice %129 {offsets = [0, 256], sizes = [8, 128], strides = [1, 1]} : vector<8x512xf32> to vector<8x128xf32>
    %147 = math.tanh %146 : vector<8x128xf32>
    %148 = vector.extract_strided_slice %129 {offsets = [0, 384], sizes = [8, 128], strides = [1, 1]} : vector<8x512xf32> to vector<8x128xf32>
    %cst_50 = arith.constant 5.000000e-01 : f32
    %149 = vector.broadcast %cst_50 : f32 to vector<8x128xf32>
    %150 = arith.mulf %149, %148 : vector<8x128xf32>
    %151 = math.tanh %150 : vector<8x128xf32>
    %cst_51 = arith.constant 5.000000e-01 : f32
    %152 = vector.broadcast %cst_51 : f32 to vector<8x128xf32>
    %153 = arith.mulf %152, %151 : vector<8x128xf32>
    %cst_52 = arith.constant 5.000000e-01 : f32
    %154 = vector.broadcast %cst_52 : f32 to vector<8x128xf32>
    %155 = arith.addf %153, %154 : vector<8x128xf32>
    %156 = arith.mulf %145, %88 : vector<8x128xf32>
    %157 = arith.mulf %137, %147 : vector<8x128xf32>
    %158 = arith.addf %156, %157 : vector<8x128xf32>
    %159 = math.tanh %158 : vector<8x128xf32>
    %160 = arith.mulf %155, %159 : vector<8x128xf32>
    %161 = tpu.concatenate %160, %127 in 1 : vector<8x128xf32>, vector<8x128xf32> -> vector<8x256xf32>
    %162 = arith.truncf %161 : vector<8x256xf32> to vector<8x256xbf16>
    %c0_53 = arith.constant 0 : index
    %c0_54 = arith.constant 0 : index
    %163 = vector.load %arg4[%c0_53, %c0_54] : memref<256x1024xbf16, #tpu.memory_space<vmem>>, vector<256x1024xbf16>
    %cst_55 = arith.constant dense<0.000000e+00> : vector<8x1024xf32>
    %164 = tpu.matmul %162, %163, %cst_55 {dimension_numbers = #tpu.dot_dimension_numbers<[1], [0], [0], [1], [0, 0, 1, 1], [], []>} : vector<8x256xbf16>, vector<256x1024xbf16>, vector<8x1024xf32> -> vector<8x1024xf32>
    %165 = vector.extract_strided_slice %164 {offsets = [0, 0], sizes = [8, 512], strides = [1, 1]} : vector<8x1024xf32> to vector<8x512xf32>
    %166 = arith.addf %165, %57 : vector<8x512xf32>
    %167 = vector.extract_strided_slice %166 {offsets = [0, 0], sizes = [8, 128], strides = [1, 1]} : vector<8x512xf32> to vector<8x128xf32>
    %cst_56 = arith.constant 5.000000e-01 : f32
    %168 = vector.broadcast %cst_56 : f32 to vector<8x128xf32>
    %169 = arith.mulf %168, %167 : vector<8x128xf32>
    %170 = math.tanh %169 : vector<8x128xf32>
    %cst_57 = arith.constant 5.000000e-01 : f32
    %171 = vector.broadcast %cst_57 : f32 to vector<8x128xf32>
    %172 = arith.mulf %171, %170 : vector<8x128xf32>
    %cst_58 = arith.constant 5.000000e-01 : f32
    %173 = vector.broadcast %cst_58 : f32 to vector<8x128xf32>
    %174 = arith.addf %172, %173 : vector<8x128xf32>
    %175 = vector.extract_strided_slice %166 {offsets = [0, 128], sizes = [8, 128], strides = [1, 1]} : vector<8x512xf32> to vector<8x128xf32>
    %cst_59 = arith.constant 5.000000e-01 : f32
    %176 = vector.broadcast %cst_59 : f32 to vector<8x128xf32>
    %177 = arith.mulf %176, %175 : vector<8x128xf32>
    %178 = math.tanh %177 : vector<8x128xf32>
    %cst_60 = arith.constant 5.000000e-01 : f32
    %179 = vector.broadcast %cst_60 : f32 to vector<8x128xf32>
    %180 = arith.mulf %179, %178 : vector<8x128xf32>
    %cst_61 = arith.constant 5.000000e-01 : f32
    %181 = vector.broadcast %cst_61 : f32 to vector<8x128xf32>
    %182 = arith.addf %180, %181 : vector<8x128xf32>
    %183 = vector.extract_strided_slice %166 {offsets = [0, 256], sizes = [8, 128], strides = [1, 1]} : vector<8x512xf32> to vector<8x128xf32>
    %184 = math.tanh %183 : vector<8x128xf32>
    %185 = vector.extract_strided_slice %166 {offsets = [0, 384], sizes = [8, 128], strides = [1, 1]} : vector<8x512xf32> to vector<8x128xf32>
    %cst_62 = arith.constant 5.000000e-01 : f32
    %186 = vector.broadcast %cst_62 : f32 to vector<8x128xf32>
    %187 = arith.mulf %186, %185 : vector<8x128xf32>
    %188 = math.tanh %187 : vector<8x128xf32>
    %cst_63 = arith.constant 5.000000e-01 : f32
    %189 = vector.broadcast %cst_63 : f32 to vector<8x128xf32>
    %190 = arith.mulf %189, %188 : vector<8x128xf32>
    %cst_64 = arith.constant 5.000000e-01 : f32
    %191 = vector.broadcast %cst_64 : f32 to vector<8x128xf32>
    %192 = arith.addf %190, %191 : vector<8x128xf32>
    %193 = arith.mulf %182, %125 : vector<8x128xf32>
    %194 = arith.mulf %174, %184 : vector<8x128xf32>
    %195 = arith.addf %193, %194 : vector<8x128xf32>
    %196 = math.tanh %195 : vector<8x128xf32>
    %197 = arith.mulf %192, %196 : vector<8x128xf32>
    %198 = vector.shape_cast %127 : vector<8x128xf32> to vector<1x1024xf32>
    %199 = vector.shape_cast %197 : vector<8x128xf32> to vector<1x1024xf32>
    %200 = tpu.concatenate %198, %199 in 0 : vector<1x1024xf32>, vector<1x1024xf32> -> vector<2x1024xf32>
    %201 = arith.truncf %200 : vector<2x1024xf32> to vector<2x1024xbf16>
    %c0_65 = arith.constant 0 : index
    %c0_66 = arith.constant 0 : index
    %202 = vector.load %arg6[%c0_65, %c0_66] : memref<1024x128xbf16, #tpu.memory_space<vmem>>, vector<1024x128xbf16>
    %cst_67 = arith.constant dense<0.000000e+00> : vector<2x128xf32>
    %203 = tpu.matmul %201, %202, %cst_67 {dimension_numbers = #tpu.dot_dimension_numbers<[1], [0], [0], [1], [0, 0, 1, 1], [], []>} : vector<2x1024xbf16>, vector<1024x128xbf16>, vector<2x128xf32> -> vector<2x128xf32>
    %c0_68 = arith.constant 0 : index
    %c0_69 = arith.constant 0 : index
    %204 = vector.load %arg7[%c0_68, %c0_69] : memref<1x128xf32, #tpu.memory_space<vmem>>, vector<1x128xf32>
    %205 = vector.broadcast %204 : vector<1x128xf32> to vector<2x128xf32>
    %206 = arith.addf %203, %205 : vector<2x128xf32>
    %cst_70 = arith.constant dense<0xFF800000> : vector<2xf32>
    %207 = vector.multi_reduction <maximumf>, %206, %cst_70 [1] : vector<2x128xf32> to vector<2xf32>
    %208 = vector.shape_cast %207 : vector<2xf32> to vector<2x1xf32>
    %209 = vector.broadcast %208 : vector<2x1xf32> to vector<2x128xf32>
    %210 = arith.subf %206, %209 : vector<2x128xf32>
    %211 = math.exp %210 : vector<2x128xf32>
    %cst_71 = arith.constant dense<0.000000e+00> : vector<2xf32>
    %212 = vector.multi_reduction <add>, %211, %cst_71 [1] : vector<2x128xf32> to vector<2xf32>
    %213 = vector.shape_cast %212 : vector<2xf32> to vector<2x1xf32>
    %214 = vector.broadcast %213 : vector<2x1xf32> to vector<2x128xf32>
    %215 = arith.divf %211, %214 : vector<2x128xf32>
    %c0_72 = arith.constant 0 : index
    %c0_73 = arith.constant 0 : index
    %216 = vector.load %arg8[%c0_72, %c0_73] : memref<2x128xf32, #tpu.memory_space<vmem>>, vector<2x128xf32>
    tpu.vector_store %arg8[%c0_72, %c0_73], %215 {strides = array<i32>} : memref<2x128xf32, #tpu.memory_space<vmem>>, vector<2x128xf32>,
    return
  }
}

</mosaic_0001>

<bundles_post_ra>
// kernel: net_forward.1
= control target key start
LH: loop header
LB: loop body
LE: loop exit
PB: predicated region body
PF: predicated region fallthrough
CT: control target
= control target key end

     0   :  { %13 = vsyncpa [#allocation5], 0  ;;  %s3544_s0 = inlined_call_operand.vmem [shape: s32[16], index: 0, kind: input, shape index: {}]   ;;  %s3545_s1 = inlined_call_operand.hbm [shape: f32[256,128], index: 1, kind: input, shape index: {}]   ;;  %s3546_s2 = inlined_call_operand.hbm [shape: bf16[128,512], index: 2, kind: input, shape index: {}]   ;;  %s3547_s3 = inlined_call_operand.vmem [shape: f32[1,512], index: 3, kind: input, shape index: {}]   ;;  %s3548_s4 = inlined_call_operand.hbm [shape: bf16[256,1024], index: 4, kind: input, shape index: {}]   ;;  %s3549_s5 = inlined_call_operand.vmem [shape: f32[1,512], index: 5, kind: input, shape index: {}]   ;;  %s3550_s6 = inlined_call_operand.hbm [shape: bf16[1024,128], index: 6, kind: input, shape index: {}]   ;;  %s3551_s7 = inlined_call_operand.vmem [shape: f32[1,128], index: 7, kind: input, shape index: {}]   ;;  %s3552_s8 = inlined_call_operand.hbm [shape: f32[2,128], index: 8, kind: output, shape index: {}]  }
   0x1   :  { %14 = vsyncpa [#allocation3], 0 }
   0x2   :  { %15 = vsyncpa [#allocation8], 0 }
   0x3   :  { %16 = vsyncpa [#allocation11], 0 }
   0x4   :  { %17 = vsyncpa [#allocation4], 0  ;;  %s3088_s27 = smov [#allocation7]   ;;  %s24_s9 = sshll.u32 %s3544_s0, 4  ;;  %s25_s9 = int_to_ptr.vmem [resolvable:$true] %s24_s9 }
   0x5   :  { %s45_s28 = sshll.u32 %s3088_s27, 4  ;;  %s2956_s12 = scalar_lea.hbm %s3546_s2, 4096  ;;  %s46_s28 = int_to_ptr.vmem [resolvable:$true] %s45_s28 }
   0x6   :  { %p2957_p0 = scmp.ne.s32.totalorder %s3546_s2, %s2956_s12  ;;  %p2960_p1 = scmp.lt.u32.totalorder %s2956_s12, %s3546_s2 }
   0x8   :  { %p2962_p2 = pnand %p2960_p1, %p2957_p0 }
   0xa   :  { %2965 = shalt.err (!%p2962_p2)
}
   0xb   :  { %s2966_s17 = scalar_lea.vmem %s46_s28, 4096  ;;  %p2971_p4 = scmp.lt.s32.totalorder %s46_s28, %s46_s28 }
   0xc   :  { %p2967_p3 = scmp.ne.s32.totalorder %s46_s28, %s2966_s17  ;;  %p2972_p5 = scmp.lt.s32.totalorder %s2966_s17, %s2966_s17 }
   0xe   :  { %p2973_p6 = por %p2972_p5, %p2971_p4 }
  0x10   :  { %p2974_p7 = pnand %p2973_p6, %p2967_p3 }
  0x12   :  { %2977 = shalt.err (!%p2974_p7)
}
  0x13   :  { %s3089_s0 = smov 256   ;;  %s3090_s18 = smov 16  }
  0x14   :  { %51 = dma.hbm_to_vmem [thread:$0]  %s3546_s2, 4096, %s46_s28, [#allocation8], %s3089_s0, %s3089_s0, %s3090_s18  }
  0x15   :  { %s2978_s21 = scalar_lea.vmem %s25_s9, 16  ;;  %p2983_p9 = scmp.lt.s32.totalorder %s25_s9, %s25_s9 }
  0x16   :  { %p2979_p8 = scmp.ne.s32.totalorder %s25_s9, %s2978_s21  ;;  %p2984_p10 = scmp.lt.s32.totalorder %s2978_s21, %s2978_s21 }
  0x18   :  { %p2985_p11 = por %p2984_p10, %p2983_p9 }
  0x1a   :  { %p2986_p12 = pnand %p2985_p11, %p2979_p8 }
  0x1c   :  { %2989 = shalt.err (!%p2986_p12)
}
  0x1d   :  { %s3091_s22 = smov [#allocation2]   ;;  %s3092_s23 = smov [#allocation6]  }
  0x1e   :  { %27 = dma.vmem_to_smem %s25_s9, 16, %s3091_s22, [#allocation5]  }
  0x1f   :  { %s33_s24 = sshll.u32 %s3092_s23, 4  ;;  %s2990_s27 = scalar_lea.hbm %s3545_s1, 4096  ;;  %s34_s24 = int_to_ptr.vmem [resolvable:$true] %s33_s24 }
  0x20   :  { %p2991_p13 = scmp.ne.s32.totalorder %s3545_s1, %s2990_s27  ;;  %p2994_p0 = scmp.lt.u32.totalorder %s2990_s27, %s3545_s1 }
  0x22   :  { %p2996_p1 = pnand %p2994_p0, %p2991_p13 }
  0x24   :  { %2999 = shalt.err (!%p2996_p1)
}
  0x25   :  { %s3000_s10 = scalar_lea.vmem %s34_s24, 4096  ;;  %p3005_p3 = scmp.lt.s32.totalorder %s34_s24, %s34_s24 }
  0x26   :  { %p3001_p2 = scmp.ne.s32.totalorder %s34_s24, %s3000_s10  ;;  %p3006_p4 = scmp.lt.s32.totalorder %s3000_s10, %s3000_s10 }
  0x28   :  { %p3007_p5 = por %p3006_p4, %p3005_p3 }
  0x2a   :  { %p3008_p6 = pnand %p3007_p5, %p3001_p2 }
  0x2c   :  { %3011 = shalt.err (!%p3008_p6)
}
  0x2d   :  { %s3093_s9 = smov 128   ;;  %s3094_s11 = smov 8  }
  0x2e   :  { %39 = dma.hbm_to_vmem [thread:$0]  %s3545_s1, 4096, %s34_s24, [#allocation3], %s3093_s9, %s3093_s9, %s3094_s11  }
  0x2f   :  { %s3095_s14 = smov [#allocation9]   ;;  %s3012_s0 = scalar_lea.hbm %s3548_s4, 16384 }
  0x30   :  { %s59_s15 = sshll.u32 %s3095_s14, 4  ;;  %p3013_p7 = scmp.ne.s32.totalorder %s3548_s4, %s3012_s0  ;;  %s60_s15 = int_to_ptr.vmem [resolvable:$true] %s59_s15 }
  0x31   :  { %p3016_p8 = scmp.lt.u32.totalorder %s3012_s0, %s3548_s4 }
  0x33   :  { %p3018_p9 = pnand %p3016_p8, %p3013_p7 }
  0x35   :  { %3021 = shalt.err (!%p3018_p9)
}
  0x36   :  { %s3022_s22 = scalar_lea.vmem %s60_s15, 16384  ;;  %p3027_p11 = scmp.lt.s32.totalorder %s60_s15, %s60_s15 }
  0x37   :  { %p3023_p10 = scmp.ne.s32.totalorder %s60_s15, %s3022_s22  ;;  %p3028_p12 = scmp.lt.s32.totalorder %s3022_s22, %s3022_s22 }
  0x39   :  { %p3029_p13 = por %p3028_p12, %p3027_p11 }
  0x3b   :  { %p3030_p0 = pnand %p3029_p13, %p3023_p10 }
  0x3d   :  { %3033 = shalt.err (!%p3030_p0)
}
  0x3e   :  { %s3096_s1 = smov 512   ;;  %s3097_s23 = smov 32  }
  0x3f   :  { %65 = dma.hbm_to_vmem [thread:$0]  %s3548_s4, 16384, %s60_s15, [#allocation8], %s3096_s1, %s3096_s1, %s3097_s23  }
  0x40   :  { %s3098_s26 = smov [#allocation10]   ;;  %s3034_s2 = scalar_lea.hbm %s3550_s6, 8192 }
  0x41   :  { %s73_s27 = sshll.u32 %s3098_s26, 4  ;;  %p3035_p1 = scmp.ne.s32.totalorder %s3550_s6, %s3034_s2  ;;  %s74_s27 = int_to_ptr.vmem [resolvable:$true] %s73_s27 }
  0x42   :  { %p3038_p2 = scmp.lt.u32.totalorder %s3034_s2, %s3550_s6 }
  0x44   :  { %p3040_p3 = pnand %p3038_p2, %p3035_p1 }
  0x46   :  { %3043 = shalt.err (!%p3040_p3)
}
  0x47   :  { %s3044_s12 = scalar_lea.vmem %s74_s27, 8192  ;;  %p3049_p5 = scmp.lt.s32.totalorder %s74_s27, %s74_s27 }
  0x48   :  { %p3045_p4 = scmp.ne.s32.totalorder %s74_s27, %s3044_s12  ;;  %p3050_p6 = scmp.lt.s32.totalorder %s3044_s12, %s3044_s12 }
  0x4a   :  { %p3051_p7 = por %p3050_p6, %p3049_p5 }
  0x4c   :  { %p3052_p8 = pnand %p3051_p7, %p3045_p4 }
  0x4e   :  { %3055 = shalt.err (!%p3052_p8)
}
  0x4f   :  { %s3099_s4 = smov 64   ;;  %s3100_s13 = smov 4  }
  0x50   :  { %79 = dma.hbm_to_vmem [thread:$0]  %s3550_s6, 8192, %s74_s27, [#allocation11], %s3099_s4, %s3099_s4, %s3100_s13  }
  0x51   :  { %3078 = dma.done.wait [#allocation5], 16  }
  0x52   :  { %3079 = vsyncadd [#allocation5], 4294967280 }
  0x53   :  { %3080 = dma.done.wait [#allocation3], 4096  }
  0x54   :  { %3081 = vsyncadd [#allocation3], 4294963200 }
  0x55   :  { %3082 = dma.done.wait [#allocation8], 20480  }
  0x56   :  { %3083 = vsyncadd [#allocation8], 4294946816 }
  0x57   :  { %3084 = dma.done.wait [#allocation11], 8192  }
  0x58   :  { %3085 = vsyncadd [#allocation11], 4294959104 }
  0x59   :  { %97 = sfence }
  0x5a   :  { %v2800_v0 = vld [vmem:[#allocation7 + $0x4] ss:$16 sps:$4 sm:$0xff]   ;;  %v2802_v1 = vld [vmem:[#allocation7] ss:$16 sps:$4 sm:$0xff]   ;;  %v3553_v2 = vmov 0   ;;  %s3201_s6 = sld [smem:[#allocation2]] }
  0x5b   :  { %457 = vmatprep.mubr.bf16.mxu0 %v3553_v2  ;;  %500 = vmatprep.mubr.bf16.mxu1 %v3553_v2  ;;  %v2803_v3 = vld [vmem:[#allocation7 + $0x24] ss:$16 sps:$4 sm:$0xff]   ;;  %v2805_v4 = vld [vmem:[#allocation7 + $0xc] ss:$16 sps:$4 sm:$0xff]   ;;  %v2807_v5 = vld [vmem:[#allocation7 + $0x20] ss:$16 sps:$4 sm:$0xff]  }
  0x5c   :  { %425 = vmatprep.subr.bf16.mxu0 %v2800_v0  ;;  %v2808_v6 = vld [vmem:[#allocation7 + $0x8] ss:$16 sps:$4 sm:$0xff]   ;;  %v2809_v7 = vld [vmem:[#allocation7 + $0x44] ss:$16 sps:$4 sm:$0xff]   ;;  %468 = vmatprep.subr.bf16.mxu1 %v2805_v4  ;;  %v2811_v8 = vld [vmem:[#allocation7 + $0x2c] ss:$16 sps:$4 sm:$0xff]  }
  0x5d   :  { %426 = vmatpush1.bf16.msra.mxu0 %v2802_v1  ;;  %s3203_s16 = sld [smem:[#allocation2 + $0x1]]  ;;  %469 = vmatpush1.bf16.msra.mxu1 %v2808_v6  ;;  %v2814_v9 = vld [vmem:[#allocation7 + $0x28] ss:$16 sps:$4 sm:$0xff]   ;;  %s3205_s17 = sld [smem:[#allocation2 + $0x2]]  ;;  %v2813_v10 = vld [vmem:[#allocation7 + $0x40] ss:$16 sps:$4 sm:$0xff]  }
  0x5e   :  { %427 = vmatprep.subr.bf16.mxu0 %v2803_v3  ;;  %470 = vmatprep.subr.bf16.mxu1 %v2811_v8  ;;  %s3207_s0 = sld [smem:[#allocation2 + $0x3]]  ;;  %v2815_v11 = vld [vmem:[#allocation7 + $0x64] ss:$16 sps:$4 sm:$0xff]   ;;  %v2817_v12 = vld [vmem:[#allocation7 + $0x4c] ss:$16 sps:$4 sm:$0xff]   ;;  %s3209_s18 = sld [smem:[#allocation2 + $0x4]] }
  0x5f   :  { %v2820_v13 = vld [vmem:[#allocation7 + $0x48] ss:$16 sps:$4 sm:$0xff]   ;;  %v2819_v14 = vld [vmem:[#allocation7 + $0x60] ss:$16 sps:$4 sm:$0xff]   ;;  %v2823_v15 = vld [vmem:[#allocation7 + $0x6c] ss:$16 sps:$4 sm:$0xff]  }
  0x60   :  { %v2821_v16 = vld [vmem:[#allocation7 + $0x84] ss:$16 sps:$4 sm:$0xff]   ;;  %s3211_s19 = sld [smem:[#allocation2 + $0x5]]  ;;  %vm189_vm0 = vcmask 1040384   ;;  %v2825_v17 = vld [vmem:[#allocation7 + $0x80] ss:$16 sps:$4 sm:$0xff]  }
  0x61   :  { %428 = vmatpush1.bf16.msra.mxu0 %v2807_v5  ;;  %471 = vmatpush1.bf16.msra.mxu1 %v2814_v9  ;;  %v2826_v18 = vld [vmem:[#allocation7 + $0x68] ss:$16 sps:$4 sm:$0xff]   ;;  %vm191_vm1 = vcmask 1041408   ;;  %v2829_v19 = vld [vmem:[#allocation7 + $0x8c] ss:$16 sps:$4 sm:$0xff]   ;;  %vm193_vm2 = vcmask 1042432  }
  0x62   :  { %429 = vmatprep.subr.bf16.mxu0 %v2809_v7  ;;  %472 = vmatprep.subr.bf16.mxu1 %v2817_v12  ;;  %v2827_v20 = vld [vmem:[#allocation7 + $0xa4] ss:$16 sps:$4 sm:$0xff]   ;;  %v2832_v21 = vld [vmem:[#allocation7 + $0x88] ss:$16 sps:$4 sm:$0xff]   ;;  %s3213_s20 = sld [smem:[#allocation2 + $0x6]]  ;;  %s3215_s21 = sld [smem:[#allocation2 + $0x7]] }
  0x63   :  { %vm195_vm3 = vcmask 1043456   ;;  %v2831_v22 = vld [vmem:[#allocation7 + $0xa0] ss:$16 sps:$4 sm:$0xff]   ;;  %v2833_v23 = vld [vmem:[#allocation7 + $0xc4] ss:$16 sps:$4 sm:$0xff]   ;;  %s100_s22 = scalar_lea.vmem [#allocation6], %s3201_s6 }
  0x64   :  { %v2835_v24 = vld [vmem:[#allocation7 + $0xac] ss:$16 sps:$4 sm:$0xff]   ;;  %v2838_v25 = vld [vmem:[#allocation7 + $0xa8] ss:$16 sps:$4 sm:$0xff]   ;;  %v101_v26 = vld [vmem:[%s100_s22] sm:$0x1] }
  0x65   :  { %430 = vmatpush1.bf16.msra.mxu0 %v2813_v10  ;;  %473 = vmatpush1.bf16.msra.mxu1 %v2820_v13  ;;  %s103_s1 = scalar_lea.vmem [#allocation6], %s3203_s16  ;;  %s106_s23 = scalar_lea.vmem [#allocation6], %s3205_s17  ;;  %vm197_vm4 = vcmask 1044480   ;;  %v2837_v29 = vld [vmem:[#allocation7 + $0xc0] ss:$16 sps:$4 sm:$0xff]   ;;  %vm199_vm5 = vcmask 1045504  }
  0x66   :  { %431 = vmatprep.subr.bf16.mxu0 %v2815_v11  ;;  %474 = vmatprep.subr.bf16.mxu1 %v2823_v15  ;;  %v104_v27 = vld [vmem:[%s103_s1] sm:$0x1]  ;;  %s109_s24 = scalar_lea.vmem [#allocation6], %s3207_s0  ;;  %s112_s25 = scalar_lea.vmem [#allocation6], %s3209_s18  ;;  %v2839_v33 = vld [vmem:[#allocation7 + $0xe4] ss:$16 sps:$4 sm:$0xff]  }
  0x67   :  { %v107_v28 = vld [vmem:[%s106_s23] sm:$0x1]  ;;  %v148_v32 = vrot.slane %v104_v27, 7  ;;  %v2841_v34 = vld [vmem:[#allocation7 + $0xcc] ss:$16 sps:$4 sm:$0xff]   ;;  %s3222_s26 = sld [smem:[#allocation2 + $0x8]] }
  0x68   :  { %v110_v30 = vld [vmem:[%s109_s24] sm:$0x1]  ;;  %s3224_s27 = sld [smem:[#allocation2 + $0x9]]  ;;  %s3226_s29 = sld [smem:[#allocation2 + $0xa]]  ;;  %v151_v35 = vrot.slane %v107_v28, 6  ;;  %vm201_vm6 = vcmask 1046528  }
  0x69   :  { %432 = vmatpush1.bf16.msra.mxu0 %v2819_v14  ;;  %475 = vmatpush1.bf16.msra.mxu1 %v2826_v18  ;;  %v113_v31 = vld [vmem:[%s112_s25] sm:$0x1]  ;;  %v154_v36 = vrot.slane %v110_v30, 5  ;;  %v190_v37 = vsel %vm189_vm0, %v101_v26, %v148_v32  ;;  %s115_s30 = scalar_lea.vmem [#allocation6], %s3211_s19  ;;  %s3230_s2 = sld [smem:[#allocation2 + $0xb]]  ;;  %v552_v15 = vld [vmem:[#allocation9] sm:$0xff] }
  0x6a   :  { %433 = vmatprep.subr.bf16.mxu0 %v2821_v16  ;;  %476 = vmatprep.subr.bf16.mxu1 %v2829_v19  ;;  %v116_v38 = vld [vmem:[%s115_s30] sm:$0x1]  ;;  %v157_v39 = vrot.slane %v113_v31, 4  ;;  %v2844_v41 = vld [vmem:[#allocation7 + $0xc8] ss:$16 sps:$4 sm:$0xff]   ;;  %s3232_s28 = sld [smem:[#allocation2 + $0xc]]  ;;  %v192_v42 = vsel %vm191_vm1, %v190_v37, %v151_v35 }
  0x6b   :  { %v2843_v40 = vld [vmem:[#allocation7 + $0xe0] ss:$16 sps:$4 sm:$0xff]   ;;  %s3234_s10 = sld [smem:[#allocation2 + $0xd]]  ;;  %s118_s9 = scalar_lea.vmem [#allocation6], %s3213_s20  ;;  %v194_v44 = vsel %vm193_vm2, %v192_v42, %v154_v36  ;;  %v160_v45 = vrot.slane %v116_v38, 3  ;;  %v557_v19 = vld [vmem:[#allocation9 + $0x28] sm:$0xff] }
  0x6c   :  { %v119_v43 = vld [vmem:[%s118_s9] sm:$0x1]  ;;  %s3238_s11 = sld [smem:[#allocation2 + $0xe]]  ;;  %s3240_s12 = sld [smem:[#allocation2 + $0xf]]  ;;  %v2845_v46 = vld [vmem:[#allocation7 + $0xec] ss:$16 sps:$4 sm:$0xff]   ;;  %v196_v48 = vsel %vm195_vm3, %v194_v44, %v157_v39 }
  0x6d   :  { %434 = vmatpush1.bf16.msra.mxu0 %v2825_v17  ;;  %477 = vmatpush1.bf16.msra.mxu1 %v2832_v21  ;;  %s121_s4 = scalar_lea.vmem [#allocation6], %s3215_s21  ;;  %v2847_v49 = vld [vmem:[#allocation7 + $0xe8] ss:$16 sps:$4 sm:$0xff]   ;;  %s124_s13 = scalar_lea.vmem [#allocation6], %s3222_s26  ;;  %v163_v52 = vrot.slane %v119_v43, 2  ;;  %v198_v58 = vsel %vm197_vm4, %v196_v48, %v160_v45  ;;  %v556_v16 = vld [vmem:[#allocation9 + $0x20] sm:$0xff] }
  0x6e   :  { %435 = vmatprep.subr.bf16.mxu0 %v2827_v20  ;;  %478 = vmatprep.subr.bf16.mxu1 %v2835_v24  ;;  %v122_v47 = vld [vmem:[%s121_s4] sm:$0x1]  ;;  %s127_s14 = scalar_lea.vmem [#allocation6], %s3224_s27  ;;  %s130_s15 = scalar_lea.vmem [#allocation6], %s3226_s29  ;;  %v553_v17 = vld [vmem:[#allocation9 + $0x8] sm:$0xff]  ;;  %v3265_v18 = vcombine.high %v552_v15, %v556_v16  ;;  %v3267_v20 = vcombine.low %v552_v15, %v556_v16  ;;  %v564_v24 = vld [vmem:[#allocation9 + $0x60] sm:$0xff] }
  0x6f   :  { %v125_v50 = vld [vmem:[%s124_s13] sm:$0x1]  ;;  %s133_s6 = scalar_lea.vmem [#allocation6], %s3230_s2  ;;  %v166_v56 = vrot.slane %v122_v47, 1  ;;  %v200_v7 = vsel %vm199_vm5, %v198_v58, %v163_v52  ;;  %v3269_v21 = vcombine.low %v553_v17, %v557_v19  ;;  %v565_v27 = vld [vmem:[#allocation9 + $0x68] sm:$0xff]  ;;  %v568_v31 = vld [vmem:[#allocation9 + $0x80] sm:$0xff] }
  0x70   :  { %v128_v51 = vld [vmem:[%s127_s14] sm:$0x1]  ;;  %s136_s16 = scalar_lea.vmem [#allocation6], %s3232_s28  ;;  %v572_v32 = vld [vmem:[#allocation9 + $0xa0] sm:$0xff]  ;;  %v573_v35 = vld [vmem:[#allocation9 + $0xa8] sm:$0xff] }
  0x71   :  { %436 = vmatpush1.bf16.msra.mxu0 %v2831_v22  ;;  %479 = vmatpush1.bf16.msra.mxu1 %v2838_v25  ;;  %v131_v53 = vld [vmem:[%s130_s15] sm:$0x1]  ;;  %v169_v54 = vrot.slane %v128_v51, 7  ;;  %s139_s17 = scalar_lea.vmem [#allocation6], %s3234_s10  ;;  %v202_v10 = vsel %vm201_vm6, %v200_v7, %v166_v56  ;;  %v3271_v22 = vcombine.high %v553_v17, %v557_v19  ;;  %v561_v25 = vld [vmem:[#allocation9 + $0x48] sm:$0xff]  ;;  %v3291_v36 = vcombine.low %v568_v31, %v572_v32  ;;  %v576_v39 = vld [vmem:[#allocation9 + $0xc0] sm:$0xff] }
  0x72   :  { %437 = vmatprep.subr.bf16.mxu0 %v2833_v23  ;;  %480 = vmatprep.subr.bf16.mxu1 %v2841_v34  ;;  %v134_v55 = vld [vmem:[%s133_s6] sm:$0x1]  ;;  %v172_v57 = vrot.slane %v131_v53, 6  ;;  %s142_s0 = scalar_lea.vmem [#allocation6], %s3238_s11  ;;  %s145_s18 = scalar_lea.vmem [#allocation6], %s3240_s12  ;;  %v560_v23 = vld [vmem:[#allocation9 + $0x40] sm:$0xff]  ;;  %v3283_v30 = vcombine.high %v561_v25, %v565_v27  ;;  %v3289_v34 = vcombine.high %v568_v31, %v572_v32  ;;  %v245_v32 = vlaneseq }
  0x73   :  { %v137_v59 = vld [vmem:[%s136_s16] sm:$0x1]  ;;  %v203_v61 = vsel %vm189_vm0, %v125_v50, %v169_v54  ;;  %v175_v0 = vrot.slane %v134_v55, 5  ;;  %v3277_v26 = vcombine.high %v560_v23, %v564_v24  ;;  %v3279_v28 = vcombine.low %v560_v23, %v564_v24  ;;  %v581_v43 = vld [vmem:[#allocation9 + $0xe8] sm:$0xff]  ;;  %v584_v47 = vld [vmem:[#allocation9 + $0x100] sm:$0xff] }
  0x74   :  { %v140_v60 = vld [vmem:[%s139_s17] sm:$0x1]  ;;  %v178_v1 = vrot.slane %v137_v59, 4  ;;  %v204_v3 = vsel %vm191_vm1, %v203_v61, %v172_v57  ;;  %v588_v48 = vld [vmem:[#allocation9 + $0x120] sm:$0xff]  ;;  %v589_v51 = vld [vmem:[#allocation9 + $0x128] sm:$0xff] }
  0x75   :  { %438 = vmatpush1.bf16.msra.mxu0 %v2837_v29  ;;  %481 = vmatpush1.bf16.msra.mxu1 %v2844_v41  ;;  %v143_v62 = vld [vmem:[%s142_s0] sm:$0x1]  ;;  %v181_v4 = vrot.slane %v140_v60, 3  ;;  %v205_v8 = vsel %vm193_vm2, %v204_v3, %v175_v0  ;;  %v3281_v29 = vcombine.low %v561_v25, %v565_v27  ;;  %v577_v41 = vld [vmem:[#allocation9 + $0xc8] sm:$0xff]  ;;  %v3313_v50 = vcombine.high %v584_v47, %v588_v48  ;;  %v592_v55 = vld [vmem:[#allocation9 + $0x140] sm:$0xff] }
  0x76   :  { %439 = vmatprep.subr.bf16.mxu0 %v2839_v33  ;;  %482 = vmatprep.subr.bf16.mxu1 %v2845_v46  ;;  %v146_v63 = vld [vmem:[%s145_s18] sm:$0x1]  ;;  %v184_v5 = vrot.slane %v143_v62, 2  ;;  %v206_v9 = vsel %vm195_vm3, %v205_v8, %v178_v1  ;;  %v569_v33 = vld [vmem:[#allocation9 + $0x88] sm:$0xff]  ;;  %v3305_v45 = vcombine.low %v577_v41, %v581_v43  ;;  %v3307_v46 = vcombine.high %v577_v41, %v581_v43  ;;  %v596_v56 = vld [vmem:[#allocation9 + $0x160] sm:$0xff] }
  0x77   :  { %v187_v6 = vrot.slane %v146_v63, 1  ;;  %v207_v11 = vsel %vm197_vm4, %v206_v9, %v181_v4  ;;  %v3293_v37 = vcombine.low %v569_v33, %v573_v35  ;;  %v3295_v38 = vcombine.high %v569_v33, %v573_v35  ;;  %v593_v57 = vld [vmem:[#allocation9 + $0x148] sm:$0xff]  ;;  %v600_v63 = vld [vmem:[#allocation9 + $0x180] sm:$0xff]  ;;  %v3360_v16 = vld [vmem:[#allocation9 + $0x10] sm:$0xff] }
  0x78   :  { %v208_v12 = vsel %vm199_vm5, %v207_v11, %v184_v5  ;;  %v3315_v52 = vcombine.low %v584_v47, %v588_v48  ;;  %v3325_v58 = vcombine.high %v592_v55, %v596_v56  ;;  %v597_v59 = vld [vmem:[#allocation9 + $0x168] sm:$0xff]  ;;  %v3327_v60 = vcombine.low %v592_v55, %v596_v56  ;;  %v604_v0 = vld [vmem:[#allocation9 + $0x1a0] sm:$0xff]  ;;  %v3362_v17 = vld [vmem:[#allocation9 + $0x30] sm:$0xff] }
  0x79   :  { %440 = vmatpush1.bf16.msra.mxu0 %v2843_v40  ;;  %483 = vmatpush1.bf16.msra.mxu1 %v2847_v49  ;;  %v209_v13 = vsel %vm201_vm6, %v208_v12, %v187_v6  ;;  %v580_v40 = vld [vmem:[#allocation9 + $0xe0] sm:$0xff]  ;;  %v585_v49 = vld [vmem:[#allocation9 + $0x108] sm:$0xff]  ;;  %v3329_v61 = vcombine.low %v593_v57, %v597_v59  ;;  %v3331_v62 = vcombine.high %v593_v57, %v597_v59  ;;  %v3364_v19 = vld [vmem:[#allocation9 + $0x18] sm:$0xff]  ;;  %v3377_v33 = vshrl.u32 %v245_v32, 7 }
  0x7a   :  { %v210_v14 = vpack.c.bf16 %v209_v13, %v202_v10  ;;  %936 = vmatprep.subr.bf16.mxu0 %v3265_v18  ;;  %977 = vmatprep.subr.bf16.mxu1 %v3271_v22  ;;  %v3301_v42 = vcombine.high %v576_v39, %v580_v40  ;;  %v3303_v44 = vcombine.low %v576_v39, %v580_v40  ;;  %v601_v1 = vld [vmem:[#allocation9 + $0x188] sm:$0xff]  ;;  %v608_v8 = vld [vmem:[#allocation9 + $0x1c0] sm:$0xff]  ;;  %v3369_v24 = vld [vmem:[#allocation9 + $0x38] sm:$0xff] }
  0x7b   :  { %v3317_v53 = vcombine.low %v585_v49, %v589_v51  ;;  %v3319_v54 = vcombine.high %v585_v49, %v589_v51  ;;  %v3337_v3 = vcombine.high %v600_v63, %v604_v0  ;;  %v605_v4 = vld [vmem:[#allocation9 + $0x1a8] sm:$0xff]  ;;  %v3339_v5 = vcombine.low %v600_v63, %v604_v0  ;;  %v612_v9 = vld [vmem:[#allocation9 + $0x1e0] sm:$0xff]  ;;  %3558 = vst [vmem:[#allocation18_spill] sm:$0xff] %v3377_v33  ;;  %v243_v39 = vld [vmem:[%s3547_s3] sm:$0xf] }
  0x7c   :  { %458 = vmatmul.mubr.bf16.vlgmr.msra.gmra.mrb[0].mxu0 %v210_v14  ;;  %501 = vmatmul.mubr.bf16.vlgmr.msra.gmra.mrb[0].mxu1 %v210_v14  ;;  %v3341_v6 = vcombine.low %v601_v1, %v605_v4  ;;  %v3343_v7 = vcombine.high %v601_v1, %v605_v4  ;;  %v609_v10 = vld [vmem:[#allocation9 + $0x1c8] sm:$0xff]  ;;  %v3349_v11 = vcombine.high %v608_v8, %v612_v9  ;;  %v3380_v35 = vsub.s32 0, %v3377_v33 }
  0x7d   :  { %968 = vmatprep.mubr.bf16.mxu0 %v3553_v2  ;;  %1009 = vmatprep.mubr.bf16.mxu1 %v3553_v2  ;;  %v613_v12 = vld [vmem:[#allocation9 + $0x1e8] sm:$0xff]  ;;  %v3351_v13 = vcombine.low %v608_v8, %v612_v9  ;;  %v2509_v23 = vcombine.high %v3360_v16, %v3362_v17  ;;  %v2511_v31 = vcombine.high %v3364_v19, %v3369_v24  ;;  %v3386_v40 = vsub.s32 1, %v3377_v33 }
  0x7e   :  { %937 = vmatpush1.bf16.msra.mxu0 %v3267_v20  ;;  %978 = vmatpush1.bf16.msra.mxu1 %v3269_v21  ;;  %v3353_v14 = vcombine.low %v609_v10, %v613_v12  ;;  %v3355_v15 = vcombine.high %v609_v10, %v613_v12  ;;  %v3389_v41 = vsub.s32 2, %v3377_v33  ;;  %v3392_v43 = vsub.s32 3, %v3377_v33 }
  0x7f   :  { %938 = vmatprep.subr.bf16.mxu0 %v3277_v26  ;;  %979 = vmatprep.subr.bf16.mxu1 %v3283_v30  ;;  %v248_v47 = vrot.slane %v243_v39, %v3380_v35  ;;  %v252_v48 = vrot.slane %v243_v39, %v3386_v40 }
  0x80   :  { %v256_v49 = vrot.slane %v243_v39, %v3389_v41  ;;  %v260_v56 = vrot.slane %v243_v39, %v3392_v43 }
  0x82   :  { %939 = vmatpush1.bf16.msra.mxu0 %v3279_v28  ;;  %980 = vmatpush1.bf16.msra.mxu1 %v3281_v29 }
  0x83   :  { %940 = vmatprep.subr.bf16.mxu0 %v3289_v34  ;;  %981 = vmatprep.subr.bf16.mxu1 %v3295_v38 }
  0x86   :  { %941 = vmatpush1.bf16.msra.mxu0 %v3291_v36  ;;  %982 = vmatpush1.bf16.msra.mxu1 %v3293_v37 }
  0x87   :  { %942 = vmatprep.subr.bf16.mxu0 %v3301_v42  ;;  %983 = vmatprep.subr.bf16.mxu1 %v3307_v46 }
  0x8a   :  { %943 = vmatpush1.bf16.msra.mxu0 %v3303_v44  ;;  %984 = vmatpush1.bf16.msra.mxu1 %v3305_v45 }
  0x8b   :  { %944 = vmatprep.subr.bf16.mxu0 %v3313_v50  ;;  %985 = vmatprep.subr.bf16.mxu1 %v3319_v54 }
  0x8e   :  { %945 = vmatpush1.bf16.msra.mxu0 %v3315_v52  ;;  %986 = vmatpush1.bf16.msra.mxu1 %v3317_v53 }
  0x8f   :  { %946 = vmatprep.subr.bf16.mxu0 %v3325_v58  ;;  %987 = vmatprep.subr.bf16.mxu1 %v3331_v62 }
  0x92   :  { %947 = vmatpush1.bf16.msra.mxu0 %v3327_v60  ;;  %988 = vmatpush1.bf16.msra.mxu1 %v3329_v61 }
  0x93   :  { %948 = vmatprep.subr.bf16.mxu0 %v3337_v3  ;;  %989 = vmatprep.subr.bf16.mxu1 %v3343_v7 }
  0x96   :  { %949 = vmatpush1.bf16.msra.mxu0 %v3339_v5  ;;  %990 = vmatpush1.bf16.msra.mxu1 %v3341_v6 }
  0x97   :  { %950 = vmatprep.subr.bf16.mxu0 %v3349_v11  ;;  %991 = vmatprep.subr.bf16.mxu1 %v3355_v15 }
  0x9a   :  { %951 = vmatpush1.bf16.msra.mxu0 %v3351_v13  ;;  %992 = vmatpush1.bf16.msra.mxu1 %v3353_v14 }
  0x9b   :  { %1018 = vmatprep.subr.bf16.mxu0 %v2509_v23  ;;  %1059 = vmatprep.subr.bf16.mxu1 %v2511_v31 }
 0x14f   :  { %v459_v51 = vpop.f32.mrb[0].mxu0  ;;  %v502_v55 = vpop.f32.mrb[0].mxu1 }
 0x150   :  { %v460_v57 = vadd.f32 %v459_v51, %v248_v47  ;;  %v461_v59 = vpop.f32.mrb[1].mxu0  ;;  %v504_v63 = vpop.f32.mrb[1].mxu1  ;;  %v503_v12 = vadd.f32 %v502_v55, %v256_v49 }
 0x151   :  { %v462_v0 = vadd.f32 %v461_v59, %v252_v48  ;;  %v463_v1 = vpop.f32.mrb[2].mxu0  ;;  %v506_v4 = vpop.f32.mrb[2].mxu1  ;;  %v505_v39 = vadd.f32 %v504_v63, %v260_v56  ;;  %v566_v63 = vld [vmem:[#allocation9 + $0x70] sm:$0xff] }
 0x152   :  { %v533_v8 = vmul.f32 0.5, %v460_v57  ;;  %v3398_v9 = vadd.f32 %v463_v1, %v248_v47  ;;  %v465_v10 = vpop.f32.mrb[3].mxu0  ;;  %v3400_v23 = vadd.f32 %v506_v4, %v256_v49  ;;  %v508_v31 = vpop.f32.mrb[3].mxu1 }
 0x153   :  { %v537_v32 = vmul.f32 0.5, %v462_v0  ;;  %v3402_v2 = vadd.f32 %v465_v10, %v252_v48  ;;  %v3404_v27 = vadd.f32 %v508_v31, %v260_v56  ;;  %v542_v51 = vmul.f32 0.5, %v505_v39  ;;  %v563_v31 = vld [vmem:[#allocation9 + $0x58] sm:$0xff] }
 0x154   :  { %2912 = vtanh.f32 %v533_v8 }
 0x155   :  { %3559 = vst [vmem:[#allocation19_spill] sm:$0xff] %v3402_v2  ;;  %3560 = vst [vmem:[#allocation20_spill] sm:$0xff] %v3404_v27  ;;  %2914 = vtanh.f32 %v537_v32  ;;  %v567_v32 = vld [vmem:[#allocation9 + $0x78] sm:$0xff]  ;;  %v3564_v2 = vmov 0  }
 0x156   :  { %2916 = vtanh.f32 %v503_v12  ;;  %v562_v12 = vld [vmem:[#allocation9 + $0x50] sm:$0xff]  ;;  %v583_v27 = vld [vmem:[#allocation9 + $0xf8] sm:$0xff] }
 0x157   :  { %2918 = vtanh.f32 %v542_v51  ;;  %v2519_v51 = vcombine.high %v563_v31, %v567_v32 }
 0x15e   :  { %v2913_v59 = vpop.eup %2912 }
 0x15f   :  { %v2915_v25 = vpop.eup %2914  ;;  %v535_v57 = vmul.f32 0.5, %v2913_v59 }
 0x160   :  { %v2917_v47 = vpop.eup %2916  ;;  %v539_v1 = vmul.f32 0.5, %v2915_v25  ;;  %v2517_v25 = vcombine.high %v562_v12, %v566_v63 }
 0x161   :  { %v536_v55 = vadd.f32 0.5, %v535_v57  ;;  %v2919_v48 = vpop.eup %2918  ;;  %v570_v57 = vld [vmem:[#allocation9 + $0x90] sm:$0xff] }
 0x162   :  { %v540_v49 = vadd.f32 0.5, %v539_v1  ;;  %v544_v8 = vmul.f32 0.5, %v2919_v48  ;;  %v571_v1 = vld [vmem:[#allocation9 + $0x98] sm:$0xff]  ;;  %v2518_v48 = vcombine.low %v563_v31, %v567_v32 }
 0x163   :  { %v547_v4 = vmul.f32 %v2917_v47, %v536_v55  ;;  %v574_v47 = vld [vmem:[#allocation9 + $0xb0] sm:$0xff]  ;;  %v3562_v55 = vcombine.low %v3360_v16, %v3362_v17  ;;  %v587_v31 = vld [vmem:[#allocation9 + $0x118] sm:$0xff] }
 0x164   :  { %v546_v33 = vmul.f32 0.0, %v540_v49  ;;  %v545_v10 = vadd.f32 0.5, %v544_v8  ;;  %v3563_v49 = vcombine.low %v3364_v19, %v3369_v24  ;;  %v2525_v8 = vcombine.high %v570_v57, %v574_v47  ;;  %v591_v32 = vld [vmem:[#allocation9 + $0x138] sm:$0xff] }
 0x165   :  { %v2524_v16 = vcombine.low %v570_v57, %v574_v47  ;;  %v595_v57 = vld [vmem:[#allocation9 + $0x158] sm:$0xff] }
 0x166   :  { %v3406_v0 = vadd.f32 %v547_v4, %v546_v33  ;;  %v575_v33 = vld [vmem:[#allocation9 + $0xb8] sm:$0xff]  ;;  %v2516_v4 = vcombine.low %v562_v12, %v566_v63  ;;  %v586_v12 = vld [vmem:[#allocation9 + $0x110] sm:$0xff] }
 0x167   :  { %v2526_v17 = vcombine.low %v571_v1, %v575_v33  ;;  %v590_v63 = vld [vmem:[#allocation9 + $0x130] sm:$0xff]  ;;  %v599_v47 = vld [vmem:[#allocation9 + $0x178] sm:$0xff] }
 0x168   :  { %3561 = vst [vmem:[#allocation21_spill] sm:$0xff] %v3406_v0  ;;  %2920 = vtanh.f32 %v3406_v0  ;;  %v579_v0 = vld [vmem:[#allocation9 + $0xd8] sm:$0xff] }
 0x169   :  { %v2535_v24 = vcombine.high %v579_v0, %v583_v27 }
 0x172   :  { %v2921_v56 = vpop.eup %2920 }
 0x173   :  { %v550_v39 = vmul.f32 %v2921_v56, %v545_v10  ;;  %v2527_v10 = vcombine.high %v571_v1, %v575_v33  ;;  %v578_v56 = vld [vmem:[#allocation9 + $0xd0] sm:$0xff]  ;;  %v2540_v1 = vcombine.low %v586_v12, %v590_v63  ;;  %v2542_v33 = vcombine.low %v587_v31, %v591_v32 }
 0x175   :  { %v3409_v59 = vpack.c.bf16 %v550_v39, %v550_v39  ;;  %v582_v39 = vld [vmem:[#allocation9 + $0xf0] sm:$0xff] }
 0x176   :  { %v2533_v19 = vcombine.high %v578_v56, %v582_v39 }
 0x177   :  { %969 = vmatmul.mubr.bf16.vlgmr.msra.gmra.mrb[4].mxu0 %v3409_v59  ;;  %1010 = vmatmul.mubr.bf16.vlgmr.msra.gmra.mrb[4].mxu1 %v3409_v59 }
 0x178   :  { %1019 = vmatpush1.bf16.msra.mxu0 %v3562_v55  ;;  %1060 = vmatpush1.bf16.msra.mxu1 %v3563_v49  ;;  %v2541_v55 = vcombine.high %v586_v12, %v590_v63  ;;  %v594_v49 = vld [vmem:[#allocation9 + $0x150] sm:$0xff]  ;;  %v611_v12 = vld [vmem:[#allocation9 + $0x1d8] sm:$0xff] }
 0x179   :  { %1020 = vmatprep.subr.bf16.mxu0 %v2517_v25  ;;  %1061 = vmatprep.subr.bf16.mxu1 %v2519_v51  ;;  %v2532_v25 = vcombine.low %v578_v56, %v582_v39  ;;  %v2534_v51 = vcombine.low %v579_v0, %v583_v27  ;;  %v603_v56 = vld [vmem:[#allocation9 + $0x198] sm:$0xff]  ;;  %v2550_v39 = vcombine.low %v595_v57, %v599_v47 }
 0x17a   :  { %1050 = vmatprep.mubr.bf16.mxu0 %v3564_v2  ;;  %1091 = vmatprep.mubr.bf16.mxu1 %v3564_v2  ;;  %v2543_v2 = vcombine.high %v587_v31, %v591_v32  ;;  %v607_v27 = vld [vmem:[#allocation9 + $0x1b8] sm:$0xff] }
 0x17b   :  { %v615_v63 = vld [vmem:[#allocation9 + $0x1f8] sm:$0xff]  ;;  %v2558_v32 = vcombine.low %v603_v56, %v607_v27 }
 0x17c   :  { %1021 = vmatpush1.bf16.msra.mxu0 %v2516_v4  ;;  %1062 = vmatpush1.bf16.msra.mxu1 %v2518_v48  ;;  %v598_v4 = vld [vmem:[#allocation9 + $0x170] sm:$0xff] }
 0x17d   :  { %1022 = vmatprep.subr.bf16.mxu0 %v2525_v8  ;;  %1063 = vmatprep.subr.bf16.mxu1 %v2527_v10  ;;  %v2549_v48 = vcombine.high %v594_v49, %v598_v4  ;;  %v2551_v8 = vcombine.high %v595_v57, %v599_v47  ;;  %v602_v10 = vld [vmem:[#allocation9 + $0x190] sm:$0xff]  ;;  %v2548_v0 = vcombine.low %v594_v49, %v598_v4  ;;  %v1196_v4 = vld [vmem:[#allocation9 + $0x320] sm:$0xff]  ;;  %v1195_v57 = vld [vmem:[#allocation9 + $0x308] sm:$0xff] }
 0x17e   :  { %v2566_v49 = vcombine.low %v611_v12, %v615_v63 }
 0x180   :  { %1023 = vmatpush1.bf16.msra.mxu0 %v2524_v16  ;;  %1064 = vmatpush1.bf16.msra.mxu1 %v2526_v17  ;;  %v606_v16 = vld [vmem:[#allocation9 + $0x1b0] sm:$0xff] }
 0x181   :  { %1024 = vmatprep.subr.bf16.mxu0 %v2533_v19  ;;  %1065 = vmatprep.subr.bf16.mxu1 %v2535_v24  ;;  %v2557_v17 = vcombine.high %v602_v10, %v606_v16  ;;  %v2559_v19 = vcombine.high %v603_v56, %v607_v27  ;;  %v610_v24 = vld [vmem:[#allocation9 + $0x1d0] sm:$0xff]  ;;  %v2556_v31 = vcombine.low %v602_v10, %v606_v16  ;;  %v1198_v10 = vld [vmem:[#allocation9 + $0x340] sm:$0xff]  ;;  %v1199_v56 = vld [vmem:[#allocation9 + $0x348] sm:$0xff] }
 0x182   :  { %v1200_v16 = vld [vmem:[#allocation9 + $0x360] sm:$0xff] }
 0x183   :  { %v2621_v27 = vcombine.high %v1198_v10, %v1200_v16 }
 0x184   :  { %1025 = vmatpush1.bf16.msra.mxu0 %v2532_v25  ;;  %1066 = vmatpush1.bf16.msra.mxu1 %v2534_v51  ;;  %v614_v25 = vld [vmem:[#allocation9 + $0x1f0] sm:$0xff] }
 0x185   :  { %1026 = vmatprep.subr.bf16.mxu0 %v2541_v55  ;;  %1067 = vmatprep.subr.bf16.mxu1 %v2543_v2  ;;  %v2565_v51 = vcombine.high %v610_v24, %v614_v25  ;;  %v2567_v55 = vcombine.high %v611_v12, %v615_v63  ;;  %v2564_v2 = vcombine.low %v610_v24, %v614_v25  ;;  %v1202_v24 = vld [vmem:[#allocation9 + $0x380] sm:$0xff]  ;;  %v1203_v12 = vld [vmem:[#allocation9 + $0x388] sm:$0xff] }
 0x186   :  { %v1204_v25 = vld [vmem:[#allocation9 + $0x3a0] sm:$0xff] }
 0x187   :  { %v2625_v63 = vcombine.high %v1202_v24, %v1204_v25 }
 0x188   :  { %1027 = vmatpush1.bf16.msra.mxu0 %v2540_v1  ;;  %1068 = vmatpush1.bf16.msra.mxu1 %v2542_v33  ;;  %v1197_v1 = vld [vmem:[#allocation9 + $0x328] sm:$0xff] }
 0x189   :  { %1028 = vmatprep.subr.bf16.mxu0 %v2549_v48  ;;  %1069 = vmatprep.subr.bf16.mxu1 %v2551_v8  ;;  %v2618_v48 = vcombine.low %v1195_v57, %v1197_v1  ;;  %v2619_v8 = vcombine.high %v1195_v57, %v1197_v1 }
 0x18c   :  { %1029 = vmatpush1.bf16.msra.mxu0 %v2548_v0  ;;  %1070 = vmatpush1.bf16.msra.mxu1 %v2550_v39  ;;  %v1201_v0 = vld [vmem:[#allocation9 + $0x368] sm:$0xff]  ;;  %v2620_v39 = vcombine.low %v1198_v10, %v1200_v16 }
 0x18d   :  { %1030 = vmatprep.subr.bf16.mxu0 %v2557_v17  ;;  %1071 = vmatprep.subr.bf16.mxu1 %v2559_v19  ;;  %v2622_v17 = vcombine.low %v1199_v56, %v1201_v0  ;;  %v2623_v19 = vcombine.high %v1199_v56, %v1201_v0 }
 0x190   :  { %1031 = vmatpush1.bf16.msra.mxu0 %v2556_v31  ;;  %1072 = vmatpush1.bf16.msra.mxu1 %v2558_v32  ;;  %v1205_v31 = vld [vmem:[#allocation9 + $0x3a8] sm:$0xff]  ;;  %v2624_v32 = vcombine.low %v1202_v24, %v1204_v25 }
 0x191   :  { %1032 = vmatprep.subr.bf16.mxu0 %v2565_v51  ;;  %1073 = vmatprep.subr.bf16.mxu1 %v2567_v55  ;;  %v2626_v51 = vcombine.low %v1203_v12, %v1205_v31  ;;  %v2627_v55 = vcombine.high %v1203_v12, %v1205_v31 }
 0x194   :  { %1033 = vmatpush1.bf16.msra.mxu0 %v2564_v2  ;;  %1074 = vmatpush1.bf16.msra.mxu1 %v2566_v49  ;;  %v1206_v2 = vld [vmem:[#allocation9 + $0x3c0] sm:$0xff] }
 0x195   :  { %1530 = vmatprep.subr.bf16.mxu0 %v3265_v18  ;;  %1571 = vmatprep.subr.bf16.mxu1 %v3271_v22  ;;  %v1178_v18 = vld [vmem:[#allocation9 + $0x200] sm:$0xff] }
 0x196   :  { %v1208_v49 = vld [vmem:[#allocation9 + $0x3e0] sm:$0xff] }
 0x197   :  { %1051 = vmatmul.mubr.bf16.vlgmr.msra.gmra.mrb[8].mxu0 %v3409_v59  ;;  %1092 = vmatmul.mubr.bf16.vlgmr.msra.gmra.mrb[8].mxu1 %v3409_v59  ;;  %v1194_v59 = vld [vmem:[#allocation9 + $0x300] sm:$0xff] }
 0x198   :  { %1531 = vmatpush1.bf16.msra.mxu0 %v3267_v20  ;;  %1572 = vmatpush1.bf16.msra.mxu1 %v3269_v21  ;;  %v1180_v20 = vld [vmem:[#allocation9 + $0x220] sm:$0xff]  ;;  %v1179_v21 = vld [vmem:[#allocation9 + $0x208] sm:$0xff]  ;;  %v2617_v47 = vcombine.high %v1194_v59, %v1196_v4  ;;  %v2616_v33 = vcombine.low %v1194_v59, %v1196_v4 }
 0x199   :  { %1532 = vmatprep.subr.bf16.mxu0 %v3277_v26  ;;  %1573 = vmatprep.subr.bf16.mxu1 %v3283_v30  ;;  %v2601_v22 = vcombine.high %v1178_v18, %v1180_v20  ;;  %v1181_v26 = vld [vmem:[#allocation9 + $0x228] sm:$0xff] }
 0x19a   :  { %v2603_v30 = vcombine.high %v1179_v21, %v1181_v26 }
 0x19c   :  { %1533 = vmatpush1.bf16.msra.mxu0 %v3279_v28  ;;  %1574 = vmatpush1.bf16.msra.mxu1 %v3281_v29  ;;  %v2600_v28 = vcombine.low %v1178_v18, %v1180_v20  ;;  %v2602_v29 = vcombine.low %v1179_v21, %v1181_v26  ;;  %v1207_v18 = vld [vmem:[#allocation9 + $0x3c8] sm:$0xff]  ;;  %v2629_v20 = vcombine.high %v1206_v2, %v1208_v49 }
 0x19d   :  { %1534 = vmatprep.subr.bf16.mxu0 %v3289_v34  ;;  %1575 = vmatprep.subr.bf16.mxu1 %v3295_v38  ;;  %v1182_v34 = vld [vmem:[#allocation9 + $0x240] sm:$0xff]  ;;  %v1209_v21 = vld [vmem:[#allocation9 + $0x3e8] sm:$0xff] }
 0x19e   :  { %v2630_v26 = vcombine.low %v1207_v18, %v1209_v21 }
 0x1a0   :  { %1535 = vmatpush1.bf16.msra.mxu0 %v3291_v36  ;;  %1576 = vmatpush1.bf16.msra.mxu1 %v3293_v37  ;;  %v1184_v36 = vld [vmem:[#allocation9 + $0x260] sm:$0xff]  ;;  %v1183_v37 = vld [vmem:[#allocation9 + $0x248] sm:$0xff] }
 0x1a1   :  { %1536 = vmatprep.subr.bf16.mxu0 %v3301_v42  ;;  %1577 = vmatprep.subr.bf16.mxu1 %v3307_v46  ;;  %v2605_v38 = vcombine.high %v1182_v34, %v1184_v36  ;;  %v1185_v42 = vld [vmem:[#allocation9 + $0x268] sm:$0xff] }
 0x1a2   :  { %v2607_v46 = vcombine.high %v1183_v37, %v1185_v42 }
 0x1a4   :  { %1537 = vmatpush1.bf16.msra.mxu0 %v3303_v44  ;;  %1578 = vmatpush1.bf16.msra.mxu1 %v3305_v45  ;;  %v2604_v44 = vcombine.low %v1182_v34, %v1184_v36  ;;  %v2606_v45 = vcombine.low %v1183_v37, %v1185_v42 }
 0x1a5   :  { %1538 = vmatprep.subr.bf16.mxu0 %v3313_v50  ;;  %1579 = vmatprep.subr.bf16.mxu1 %v3319_v54  ;;  %v1186_v50 = vld [vmem:[#allocation9 + $0x280] sm:$0xff] }
 0x1a8   :  { %1539 = vmatpush1.bf16.msra.mxu0 %v3315_v52  ;;  %1580 = vmatpush1.bf16.msra.mxu1 %v3317_v53  ;;  %v1188_v52 = vld [vmem:[#allocation9 + $0x2a0] sm:$0xff]  ;;  %v1187_v53 = vld [vmem:[#allocation9 + $0x288] sm:$0xff] }
 0x1a9   :  { %1540 = vmatprep.subr.bf16.mxu0 %v3325_v58  ;;  %1581 = vmatprep.subr.bf16.mxu1 %v3331_v62  ;;  %v2609_v54 = vcombine.high %v1186_v50, %v1188_v52  ;;  %v1189_v58 = vld [vmem:[#allocation9 + $0x2a8] sm:$0xff] }
 0x1aa   :  { %v2611_v62 = vcombine.high %v1187_v53, %v1189_v58 }
 0x1ac   :  { %1541 = vmatpush1.bf16.msra.mxu0 %v3327_v60  ;;  %1582 = vmatpush1.bf16.msra.mxu1 %v3329_v61  ;;  %v2608_v60 = vcombine.low %v1186_v50, %v1188_v52  ;;  %v2610_v61 = vcombine.low %v1187_v53, %v1189_v58 }
 0x1ad   :  { %1542 = vmatprep.subr.bf16.mxu0 %v3337_v3  ;;  %1583 = vmatprep.subr.bf16.mxu1 %v3343_v7  ;;  %v1190_v3 = vld [vmem:[#allocation9 + $0x2c0] sm:$0xff] }
 0x1b0   :  { %1543 = vmatpush1.bf16.msra.mxu0 %v3339_v5  ;;  %1584 = vmatpush1.bf16.msra.mxu1 %v3341_v6  ;;  %v1192_v5 = vld [vmem:[#allocation9 + $0x2e0] sm:$0xff]  ;;  %v1191_v6 = vld [vmem:[#allocation9 + $0x2c8] sm:$0xff] }
 0x1b1   :  { %1544 = vmatprep.subr.bf16.mxu0 %v3349_v11  ;;  %1585 = vmatprep.subr.bf16.mxu1 %v3355_v15  ;;  %v2613_v7 = vcombine.high %v1190_v3, %v1192_v5  ;;  %v1193_v11 = vld [vmem:[#allocation9 + $0x2e8] sm:$0xff] }
 0x1b2   :  { %v2615_v15 = vcombine.high %v1191_v6, %v1193_v11 }
 0x1b4   :  { %1545 = vmatpush1.bf16.msra.mxu0 %v3351_v13  ;;  %1586 = vmatpush1.bf16.msra.mxu1 %v3353_v14  ;;  %v2612_v13 = vcombine.low %v1190_v3, %v1192_v5  ;;  %v2614_v14 = vcombine.low %v1191_v6, %v1193_v11 }
 0x1b5   :  { %1546 = vmatprep.subr.bf16.mxu0 %v2601_v22  ;;  %1587 = vmatprep.subr.bf16.mxu1 %v2603_v30  ;;  %v2628_v22 = vcombine.low %v1206_v2, %v1208_v49 }
 0x1b8   :  { %1547 = vmatpush1.bf16.msra.mxu0 %v2600_v28  ;;  %1588 = vmatpush1.bf16.msra.mxu1 %v2602_v29  ;;  %v2631_v28 = vcombine.high %v1207_v18, %v1209_v21  ;;  %v511_v29 = vld [vmem:[%s3549_s5] sm:$0xf] }
 0x1b9   :  { %1548 = vmatprep.subr.bf16.mxu0 %v2605_v38  ;;  %1589 = vmatprep.subr.bf16.mxu1 %v2607_v46  ;;  %v3459_v30 = vrot.slane %v511_v29, %v3380_v35  ;;  %v3462_v34 = vrot.slane %v511_v29, %v3386_v40  ;;  %v3466_v42 = vrot.slane %v511_v29, %v3389_v41 }
 0x1bc   :  { %1549 = vmatpush1.bf16.msra.mxu0 %v2604_v44  ;;  %1590 = vmatpush1.bf16.msra.mxu1 %v2606_v45 }
 0x1bd   :  { %1550 = vmatprep.subr.bf16.mxu0 %v2609_v54  ;;  %1591 = vmatprep.subr.bf16.mxu1 %v2611_v62  ;;  %v3471_v62 = vrot.slane %v511_v29, %v3392_v43 }
 0x1c0   :  { %1551 = vmatpush1.bf16.msra.mxu0 %v2608_v60  ;;  %1592 = vmatpush1.bf16.msra.mxu1 %v2610_v61 }
 0x1c1   :  { %1552 = vmatprep.subr.bf16.mxu0 %v2613_v7  ;;  %1593 = vmatprep.subr.bf16.mxu1 %v2615_v15 }
 0x1c4   :  { %1553 = vmatpush1.bf16.msra.mxu0 %v2612_v13  ;;  %1594 = vmatpush1.bf16.msra.mxu1 %v2614_v14 }
 0x1c5   :  { %1554 = vmatprep.subr.bf16.mxu0 %v2617_v47  ;;  %1595 = vmatprep.subr.bf16.mxu1 %v2619_v8 }
 0x1c8   :  { %1555 = vmatpush1.bf16.msra.mxu0 %v2616_v33  ;;  %1596 = vmatpush1.bf16.msra.mxu1 %v2618_v48 }
 0x1c9   :  { %1556 = vmatprep.subr.bf16.mxu0 %v2621_v27  ;;  %1597 = vmatprep.subr.bf16.mxu1 %v2623_v19  ;;  %v3566_v19 = vld [vmem:[#allocation20_spill] sm:$0xff] }
 0x1cc   :  { %1557 = vmatpush1.bf16.msra.mxu0 %v2620_v39  ;;  %1598 = vmatpush1.bf16.msra.mxu1 %v2622_v17  ;;  %v3565_v39 = vld [vmem:[#allocation19_spill] sm:$0xff] }
 0x1cd   :  { %1558 = vmatprep.subr.bf16.mxu0 %v2625_v63  ;;  %1599 = vmatprep.subr.bf16.mxu1 %v2627_v55 }
 0x1d0   :  { %1559 = vmatpush1.bf16.msra.mxu0 %v2624_v32  ;;  %1600 = vmatpush1.bf16.msra.mxu1 %v2626_v51 }
 0x1d1   :  { %1560 = vmatprep.subr.bf16.mxu0 %v2629_v20  ;;  %1601 = vmatprep.subr.bf16.mxu1 %v2631_v28 }
 0x1d4   :  { %1561 = vmatpush1.bf16.msra.mxu0 %v2628_v22  ;;  %1602 = vmatpush1.bf16.msra.mxu1 %v2630_v26 }
 0x24a   :  { %v970_v36 = vpop.f32.mrb[4].mxu0  ;;  %v1011_v37 = vpop.f32.mrb[4].mxu1 }
 0x24b   :  { %v1100_v38 = vadd.f32 %v970_v36, %v3459_v30  ;;  %v972_v44 = vpop.f32.mrb[5].mxu0  ;;  %v1013_v45 = vpop.f32.mrb[5].mxu1  ;;  %v1102_v61 = vadd.f32 %v1011_v37, %v3466_v42  ;;  %v3567_v36 = vld [vmem:[#allocation21_spill] sm:$0xff] }
 0x24c   :  { %v1101_v46 = vadd.f32 %v972_v44, %v3462_v34  ;;  %v974_v50 = vpop.f32.mrb[6].mxu0  ;;  %v1015_v52 = vpop.f32.mrb[6].mxu1  ;;  %v1103_v3 = vadd.f32 %v1013_v45, %v3471_v62 }
 0x24d   :  { %v1104_v53 = vmul.f32 0.5, %v1100_v38  ;;  %v975_v54 = vpop.f32.mrb[7].mxu0  ;;  %v1016_v58 = vpop.f32.mrb[7].mxu1 }
 0x24e   :  { %v1108_v60 = vmul.f32 0.5, %v1101_v46  ;;  %v1113_v5 = vmul.f32 0.5, %v1103_v3  ;;  %v2848_v54 = vld [vmem:[#allocation10 + $0x40] sm:$0xff]   ;;  %v2852_v3 = vld [vmem:[#allocation10 + $0x48] sm:$0xff]  }
 0x24f   :  { %2922 = vtanh.f32 %v1104_v53  ;;  %v2849_v58 = vld [vmem:[#allocation10 + $0xc0] sm:$0xff]   ;;  %2697 = vmatprep.subr.bf16.mxu0 %v2848_v54 }
 0x250   :  { %2924 = vtanh.f32 %v1108_v60  ;;  %v2850_v60 = vld [vmem:[#allocation10] sm:$0xff]   ;;  %2719 = vmatprep.subr.bf16.mxu1 %v2849_v58 }
 0x251   :  { %2926 = vtanh.f32 %v1102_v61  ;;  %v2851_v61 = vld [vmem:[#allocation10 + $0x80] sm:$0xff]  }
 0x252   :  { %2928 = vtanh.f32 %v1113_v5  ;;  %v2853_v5 = vld [vmem:[#allocation10 + $0xc8] sm:$0xff]  }
 0x259   :  { %v2923_v6 = vpop.eup %2922 }
 0x25a   :  { %v2925_v7 = vpop.eup %2924  ;;  %v1106_v11 = vmul.f32 0.5, %v2923_v6  ;;  %v2854_v6 = vld [vmem:[#allocation10 + $0x8] sm:$0xff]  }
 0x25b   :  { %v1110_v13 = vmul.f32 0.5, %v2925_v7  ;;  %v2927_v15 = vpop.eup %2926  ;;  %v2855_v7 = vld [vmem:[#allocation10 + $0x88] sm:$0xff]  }
 0x25c   :  { %v1107_v14 = vadd.f32 0.5, %v1106_v11  ;;  %v2929_v1 = vpop.eup %2928  ;;  %v2856_v11 = vld [vmem:[#allocation10 + $0x50] sm:$0xff]  }
 0x25d   :  { %v1111_v59 = vadd.f32 0.5, %v1110_v13  ;;  %v1115_v33 = vmul.f32 0.5, %v2929_v1  ;;  %v2857_v13 = vld [vmem:[#allocation10 + $0xd0] sm:$0xff]   ;;  %v2863_v1 = vld [vmem:[#allocation10 + $0x98] sm:$0xff]  }
 0x25e   :  { %v1118_v4 = vmul.f32 %v2927_v15, %v1107_v14  ;;  %v2858_v14 = vld [vmem:[#allocation10 + $0x10] sm:$0xff]  }
 0x25f   :  { %v1117_v57 = vmul.f32 0.0, %v1111_v59  ;;  %v1116_v0 = vadd.f32 0.5, %v1115_v33  ;;  %v2859_v15 = vld [vmem:[#allocation10 + $0x90] sm:$0xff]   ;;  %v2860_v59 = vld [vmem:[#allocation10 + $0x58] sm:$0xff]   ;;  %v2864_v33 = vld [vmem:[#allocation10 + $0x60] sm:$0xff]  }
 0x261   :  { %v3474_v47 = vadd.f32 %v1118_v4, %v1117_v57  ;;  %v2861_v4 = vld [vmem:[#allocation10 + $0xd8] sm:$0xff]  }
 0x262   :  { %v2862_v57 = vld [vmem:[#allocation10 + $0x18] sm:$0xff]  }
 0x263   :  { %2930 = vtanh.f32 %v3474_v47 }
 0x26a   :  { %v1052_v48 = vpop.f32.mrb[8].mxu0  ;;  %v1093_v8 = vpop.f32.mrb[8].mxu1 }
 0x26b   :  { %v1122_v10 = vadd.f32 %v1052_v48, %v3398_v9  ;;  %v1124_v16 = vadd.f32 %v1093_v8, %v3400_v23  ;;  %v1054_v56 = vpop.f32.mrb[9].mxu0  ;;  %v1095_v27 = vpop.f32.mrb[9].mxu1  ;;  %v2865_v48 = vld [vmem:[#allocation10 + $0xe0] sm:$0xff]  }
 0x26c   :  { %v1123_v17 = vadd.f32 %v1054_v56, %v3565_v39  ;;  %v1125_v24 = vadd.f32 %v1095_v27, %v3566_v19  ;;  %v1056_v25 = vpop.f32.mrb[10].mxu0  ;;  %v1097_v12 = vpop.f32.mrb[10].mxu1  ;;  %v2866_v8 = vld [vmem:[#allocation10 + $0x20] sm:$0xff]   ;;  %v2869_v56 = vld [vmem:[#allocation10 + $0xe8] sm:$0xff]   ;;  %v2872_v39 = vld [vmem:[#allocation10 + $0x70] sm:$0xff]  }
 0x26d   :  { %v2931_v63 = vpop.eup %2930  ;;  %v1126_v31 = vmul.f32 0.5, %v1122_v10  ;;  %v1057_v32 = vpop.f32.mrb[11].mxu0  ;;  %v2867_v10 = vld [vmem:[#allocation10 + $0xa0] sm:$0xff]   ;;  %v2870_v27 = vld [vmem:[#allocation10 + $0x28] sm:$0xff]   ;;  %v2874_v19 = vld [vmem:[#allocation10 + $0x30] sm:$0xff]  }
 0x26e   :  { %v1098_v51 = vpop.f32.mrb[11].mxu1  ;;  %v3481_v55 = vmul.f32 %v2931_v63, %v1116_v0  ;;  %v1130_v2 = vmul.f32 0.5, %v1123_v17  ;;  %v1135_v23 = vmul.f32 0.5, %v1125_v24  ;;  %v2871_v0 = vld [vmem:[#allocation10 + $0xa8] sm:$0xff]   ;;  %v2873_v17 = vld [vmem:[#allocation10 + $0xf0] sm:$0xff]   ;;  %v2876_v25 = vld [vmem:[#allocation10 + $0x78] sm:$0xff]  }
 0x26f   :  { %2932 = vtanh.f32 %v1126_v31  ;;  %v2875_v24 = vld [vmem:[#allocation10 + $0xb0] sm:$0xff]   ;;  %v2877_v12 = vld [vmem:[#allocation10 + $0xf8] sm:$0xff]   ;;  %v2880_v32 = vld [vmem:[#allocation10 + $0x140] sm:$0xff]  }
 0x270   :  { %2934 = vtanh.f32 %v1130_v2  ;;  %v1145_v9 = vpack.c.bf16 %v3481_v55, %v3481_v55  ;;  %v2878_v63 = vld [vmem:[#allocation10 + $0x38] sm:$0xff]   ;;  %v2881_v51 = vld [vmem:[#allocation10 + $0x1c0] sm:$0xff]  }
 0x271   :  { %2936 = vtanh.f32 %v1124_v16  ;;  %v2868_v16 = vld [vmem:[#allocation10 + $0x68] sm:$0xff]   ;;  %v2879_v31 = vld [vmem:[#allocation10 + $0xb8] sm:$0xff]  }
 0x272   :  { %1562 = vmatprep.mubr.bf16.mxu0 %v1145_v9  ;;  %1603 = vmatprep.mubr.bf16.mxu1 %v1145_v9  ;;  %2938 = vtanh.f32 %v1135_v23 }
 0x279   :  { %v2933_v49 = vpop.eup %2932 }
 0x27a   :  { %v2935_v18 = vpop.eup %2934  ;;  %v1128_v20 = vmul.f32 0.5, %v2933_v49 }
 0x27b   :  { %v1132_v21 = vmul.f32 0.5, %v2935_v18  ;;  %v2937_v26 = vpop.eup %2936 }
 0x27c   :  { %v1129_v22 = vadd.f32 0.5, %v1128_v20  ;;  %v2939_v44 = vpop.eup %2938 }
 0x27d   :  { %v1133_v28 = vadd.f32 0.5, %v1132_v21  ;;  %v1137_v45 = vmul.f32 0.5, %v2939_v44 }
 0x27e   :  { %v1140_v29 = vmul.f32 %v2937_v26, %v1129_v22 }
 0x27f   :  { %v1139_v37 = vmul.f32 %v1133_v28, %v3567_v36  ;;  %v1138_v46 = vadd.f32 0.5, %v1137_v45 }
 0x281   :  { %v1141_v38 = vadd.f32 %v1140_v29, %v1139_v37 }
 0x283   :  { %2940 = vtanh.f32 %v1141_v38 }
 0x28d   :  { %v2941_v50 = vpop.eup %2940 }
 0x28e   :  { %v1143_v52 = vmul.f32 %v2941_v50, %v1138_v46 }
 0x290   :  { %v1144_v53 = vpack.c.bf16 %v1143_v52, %v1143_v52 }
 0x292   :  { %1563 = vmatmul.mubr.bf16.vlgmr.msra.gmra.mrb[12].mxu0 %v1144_v53  ;;  %1604 = vmatmul.mubr.bf16.vlgmr.msra.gmra.mrb[12].mxu1 %v1144_v53 }
 0x293   :  { %2698 = vmatpush3.bf16.msra.mxu0 %v2850_v60  ;;  %2720 = vmatpush3.bf16.msra.mxu1 %v2851_v61 }
 0x294   :  { %2699 = vmatprep.subr.bf16.mxu0 %v2852_v3  ;;  %2721 = vmatprep.subr.bf16.mxu1 %v2853_v5  ;;  %v3568_v3 = vld [vmem:[#allocation18_spill] sm:$0xff] }
 0x295   :  { %v1657_v5 = vsub.s32 5, %v3568_v3 }
 0x297   :  { %2700 = vmatpush3.bf16.msra.mxu0 %v2854_v6  ;;  %2722 = vmatpush3.bf16.msra.mxu1 %v2855_v7  ;;  %v1653_v6 = vsub.s32 4, %v3568_v3  ;;  %v1661_v7 = vsub.s32 6, %v3568_v3 }
 0x298   :  { %2701 = vmatprep.subr.bf16.mxu0 %v2856_v11  ;;  %2723 = vmatprep.subr.bf16.mxu1 %v2857_v13 }
 0x29b   :  { %2702 = vmatpush3.bf16.msra.mxu0 %v2858_v14  ;;  %2724 = vmatpush3.bf16.msra.mxu1 %v2859_v15  ;;  %v1642_v14 = vrot.slane %v3481_v55, %v3386_v40 }
 0x29c   :  { %2703 = vmatprep.subr.bf16.mxu0 %v2860_v59  ;;  %2725 = vmatprep.subr.bf16.mxu1 %v2861_v4  ;;  %v1638_v59 = vrot.slane %v3481_v55, %v3380_v35  ;;  %v1646_v4 = vrot.slane %v3481_v55, %v3389_v41 }
 0x29f   :  { %2704 = vmatpush3.bf16.msra.mxu0 %v2862_v57  ;;  %2726 = vmatpush3.bf16.msra.mxu1 %v2863_v1  ;;  %v1658_v57 = vrot.slane %v3481_v55, %v1657_v5 }
 0x2a0   :  { %2705 = vmatprep.subr.bf16.mxu0 %v2864_v33  ;;  %2727 = vmatprep.subr.bf16.mxu1 %v2865_v48  ;;  %v1654_v33 = vrot.slane %v3481_v55, %v1653_v6  ;;  %v1662_v48 = vrot.slane %v3481_v55, %v1661_v7 }
 0x2a3   :  { %2706 = vmatpush3.bf16.msra.mxu0 %v2866_v8  ;;  %2728 = vmatpush3.bf16.msra.mxu1 %v2867_v10 }
 0x2a4   :  { %2707 = vmatprep.subr.bf16.mxu0 %v2868_v16  ;;  %2729 = vmatprep.subr.bf16.mxu1 %v2869_v56 }
 0x2a7   :  { %2708 = vmatpush3.bf16.msra.mxu0 %v2870_v27  ;;  %2730 = vmatpush3.bf16.msra.mxu1 %v2871_v0 }
 0x2a8   :  { %2709 = vmatprep.subr.bf16.mxu0 %v2872_v39  ;;  %2731 = vmatprep.subr.bf16.mxu1 %v2873_v17 }
 0x2ab   :  { %2710 = vmatpush3.bf16.msra.mxu0 %v2874_v19  ;;  %2732 = vmatpush3.bf16.msra.mxu1 %v2875_v24 }
 0x2ac   :  { %2711 = vmatprep.subr.bf16.mxu0 %v2876_v25  ;;  %2733 = vmatprep.subr.bf16.mxu1 %v2877_v12 }
 0x2af   :  { %2712 = vmatpush3.bf16.msra.mxu0 %v2878_v63  ;;  %2734 = vmatpush3.bf16.msra.mxu1 %v2879_v31  ;;  %v2882_v31 = vld [vmem:[#allocation10 + $0x100] sm:$0xff]  }
 0x2b0   :  { %2741 = vmatprep.subr.bf16.mxu0 %v2880_v32  ;;  %2763 = vmatprep.subr.bf16.mxu1 %v2881_v51 }
 0x365   :  { %v1564_v2 = vpop.f32.mrb[12].mxu0  ;;  %v1605_v9 = vpop.f32.mrb[12].mxu1 }
 0x366   :  { %v1612_v23 = vadd.f32 %v1564_v2, %v3459_v30  ;;  %v1566_v49 = vpop.f32.mrb[13].mxu0  ;;  %v1607_v18 = vpop.f32.mrb[13].mxu1  ;;  %v1614_v37 = vadd.f32 %v1605_v9, %v3466_v42  ;;  %v2884_v9 = vld [vmem:[#allocation10 + $0x148] sm:$0xff]  }
 0x367   :  { %v1613_v20 = vadd.f32 %v1566_v49, %v3462_v34  ;;  %v1568_v21 = vpop.f32.mrb[14].mxu0  ;;  %v1609_v22 = vpop.f32.mrb[14].mxu1  ;;  %v1615_v38 = vadd.f32 %v1607_v18, %v3471_v62  ;;  %v1665_v62 = vsub.s32 7, %v3568_v3  ;;  %v2908_v3 = vld [vmem:[#allocation10 + $0x178] sm:$0xff]  }
 0x368   :  { %v1616_v26 = vmul.f32 0.5, %v1612_v23  ;;  %v1569_v28 = vpop.f32.mrb[15].mxu0  ;;  %v1610_v29 = vpop.f32.mrb[15].mxu1  ;;  %v2885_v23 = vld [vmem:[#allocation10 + $0x1c8] sm:$0xff]   ;;  %v2888_v22 = vld [vmem:[#allocation10 + $0x150] sm:$0xff]  }
 0x369   :  { %v1620_v36 = vmul.f32 0.5, %v1613_v20  ;;  %v1625_v44 = vmul.f32 0.5, %v1615_v38  ;;  %v1666_v1 = vrot.slane %v3481_v55, %v1665_v62  ;;  %v2886_v20 = vld [vmem:[#allocation10 + $0x108] sm:$0xff]   ;;  %v2890_v28 = vld [vmem:[#allocation10 + $0x110] sm:$0xff]   ;;  %v2894_v38 = vld [vmem:[#allocation10 + $0x118] sm:$0xff]  }
 0x36a   :  { %2942 = vtanh.f32 %v1616_v26  ;;  %v2887_v21 = vld [vmem:[#allocation10 + $0x188] sm:$0xff]   ;;  %v2889_v26 = vld [vmem:[#allocation10 + $0x1d0] sm:$0xff]  }
 0x36b   :  { %2944 = vtanh.f32 %v1620_v36  ;;  %v2891_v29 = vld [vmem:[#allocation10 + $0x190] sm:$0xff]   ;;  %v2892_v36 = vld [vmem:[#allocation10 + $0x158] sm:$0xff]  }
 0x36c   :  { %2946 = vtanh.f32 %v1614_v37  ;;  %v2893_v37 = vld [vmem:[#allocation10 + $0x1d8] sm:$0xff]  }
 0x36d   :  { %2948 = vtanh.f32 %v1625_v44  ;;  %v2895_v44 = vld [vmem:[#allocation10 + $0x198] sm:$0xff]  }
 0x374   :  { %v2943_v45 = vpop.eup %2942 }
 0x375   :  { %v2945_v30 = vpop.eup %2944  ;;  %v1618_v46 = vmul.f32 0.5, %v2943_v45  ;;  %v2896_v45 = vld [vmem:[#allocation10 + $0x160] sm:$0xff]  }
 0x376   :  { %v1622_v50 = vmul.f32 0.5, %v2945_v30  ;;  %v2947_v52 = vpop.eup %2946  ;;  %v2897_v30 = vld [vmem:[#allocation10 + $0x1e0] sm:$0xff]  }
 0x377   :  { %v1619_v34 = vadd.f32 0.5, %v1618_v46  ;;  %v2949_v61 = vpop.eup %2948  ;;  %v2898_v46 = vld [vmem:[#allocation10 + $0x120] sm:$0xff]  }
 0x378   :  { %v1623_v53 = vadd.f32 0.5, %v1622_v50  ;;  %v1627_v42 = vmul.f32 0.5, %v2949_v61  ;;  %v2899_v50 = vld [vmem:[#allocation10 + $0x1a0] sm:$0xff]   ;;  %v2906_v61 = vld [vmem:[#allocation10 + $0x130] sm:$0xff]  }
 0x379   :  { %v1630_v54 = vmul.f32 %v2947_v52, %v1619_v34  ;;  %v2900_v34 = vld [vmem:[#allocation10 + $0x168] sm:$0xff]  }
 0x37a   :  { %v1629_v58 = vmul.f32 %v1623_v53, %v3474_v47  ;;  %v1628_v11 = vadd.f32 0.5, %v1627_v42  ;;  %v1650_v47 = vrot.slane %v3481_v55, %v3392_v43  ;;  %v2901_v52 = vld [vmem:[#allocation10 + $0x1e8] sm:$0xff]   ;;  %v2907_v42 = vld [vmem:[#allocation10 + $0x1b0] sm:$0xff]  }
 0x37b   :  { %v2902_v53 = vld [vmem:[#allocation10 + $0x128] sm:$0xff]  }
 0x37c   :  { %v1631_v60 = vadd.f32 %v1630_v54, %v1629_v58  ;;  %v2903_v54 = vld [vmem:[#allocation10 + $0x1a8] sm:$0xff]   ;;  %v2904_v58 = vld [vmem:[#allocation10 + $0x170] sm:$0xff]  }
 0x37e   :  { %2950 = vtanh.f32 %v1631_v60  ;;  %v2905_v60 = vld [vmem:[#allocation10 + $0x1f0] sm:$0xff]  }
 0x388   :  { %v2951_v13 = vpop.eup %2950 }
 0x389   :  { %v1633_v15 = vmul.f32 %v2951_v13, %v1628_v11 }
 0x38b   :  { %v1683_v8 = vrot.slane %v1633_v15, %v3386_v40  ;;  %v1691_v10 = vrot.slane %v1633_v15, %v3392_v43  ;;  %v1679_v16 = vrot.slane %v1633_v15, %v3380_v35  ;;  %v1687_v56 = vrot.slane %v1633_v15, %v3389_v41  ;;  %v2883_v35 = vld [vmem:[#allocation10 + $0x180] sm:$0xff]  }
 0x38c   :  { %v1699_v27 = vrot.slane %v1633_v15, %v1657_v5  ;;  %v1707_v0 = vrot.slane %v1633_v15, %v1665_v62  ;;  %v1695_v39 = vrot.slane %v1633_v15, %v1653_v6  ;;  %v1703_v17 = vrot.slane %v1633_v15, %v1661_v7  ;;  %v2909_v5 = vld [vmem:[#allocation10 + $0x1f8] sm:$0xff]   ;;  %v2632_v15 = vld [vmem:[%s3551_s7] ss:$0 sm:$0xff]  ;;  %s3102_s7 = smov [#allocation12]  }
 0x38d   :  { %v1717_v19 = vsel %vm189_vm0, %v1642_v14, %v1683_v8  ;;  %v1719_v24 = vsel %vm189_vm0, %v1650_v47, %v1691_v10  ;;  %v1716_v25 = vsel %vm189_vm0, %v1638_v59, %v1679_v16  ;;  %v1718_v55 = vsel %vm189_vm0, %v1646_v4, %v1687_v56  ;;  %v2910_v62 = vld [vmem:[#allocation10 + $0x138] sm:$0xff]   ;;  %s2429_s1 = sshll.u32 %s3102_s7, 4  ;;  %s2430_s1 = int_to_ptr.vmem [resolvable:$true] %s2429_s1 }
 0x38e   :  { %v1725_v12 = vpack.c.bf16 %v1717_v19, %v1717_v19  ;;  %v1727_v40 = vpack.c.bf16 %v1719_v24, %v1719_v24  ;;  %v1724_v63 = vpack.c.bf16 %v1716_v25, %v1716_v25  ;;  %v1726_v43 = vpack.c.bf16 %v1718_v55, %v1718_v55  ;;  %v2911_v6 = vld [vmem:[#allocation10 + $0x1b8] sm:$0xff]   ;;  %s3056_s23 = scalar_lea.vmem %s2430_s1, 32  ;;  %p3061_p10 = scmp.lt.s32.totalorder %s2430_s1, %s2430_s1 }
 0x38f   :  { %v1721_v41 = vsel %vm189_vm0, %v1658_v57, %v1699_v27  ;;  %v1723_v32 = vsel %vm189_vm0, %v1666_v1, %v1707_v0  ;;  %v3518_v51 = vsel %vm189_vm0, %v1654_v33, %v1695_v39  ;;  %v3521_v2 = vsel %vm189_vm0, %v1662_v48, %v1703_v17  ;;  %p3057_p9 = scmp.ne.s32.totalorder %s2430_s1, %s3056_s23  ;;  %p3062_p11 = scmp.lt.s32.totalorder %s3056_s23, %s3056_s23 }
 0x390   :  { %2283 = vmatprep.mubr.bf16.mxu0 %v1725_v12  ;;  %2323 = vmatprep.mubr.bf16.mxu1 %v1727_v40  ;;  %v1729_v49 = vpack.c.bf16 %v1721_v41, %v1721_v41  ;;  %v1731_v18 = vpack.c.bf16 %v1723_v32, %v1723_v32  ;;  %v1728_v7 = vpack.c.bf16 %v3518_v51, %v3518_v51 }
 0x391   :  { %2284 = vmatmul.mubr.bf16.vlgmr.msra.gmra.mrb[16].mxu0 %v1724_v63  ;;  %2324 = vmatmul.mubr.bf16.vlgmr.msra.gmra.mrb[16].mxu1 %v1726_v43  ;;  %v1730_v11 = vpack.c.bf16 %v3521_v2, %v3521_v2  ;;  %p3063_p12 = por %p3062_p11, %p3061_p10 }
 0x392   :  { %2742 = vmatpush3.bf16.msra.mxu0 %v2882_v31  ;;  %2764 = vmatpush3.bf16.msra.mxu1 %v2883_v35 }
 0x393   :  { %2363 = vmatprep.mubr.bf16.mxu0 %v1729_v49  ;;  %2403 = vmatprep.mubr.bf16.mxu1 %v1731_v18  ;;  %p3064_p13 = pnand %p3063_p12, %p3057_p9 }
 0x394   :  { %2743 = vmatprep.subr.bf16.mxu0 %v2884_v9  ;;  %2765 = vmatprep.subr.bf16.mxu1 %v2885_v23 }
 0x396   :  { %2744 = vmatpush3.bf16.msra.mxu0 %v2886_v20  ;;  %2766 = vmatpush3.bf16.msra.mxu1 %v2887_v21 }
 0x397   :  { %2745 = vmatprep.subr.bf16.mxu0 %v2888_v22  ;;  %2767 = vmatprep.subr.bf16.mxu1 %v2889_v26 }
 0x39a   :  { %2746 = vmatpush3.bf16.msra.mxu0 %v2890_v28  ;;  %2768 = vmatpush3.bf16.msra.mxu1 %v2891_v29 }
 0x39b   :  { %2747 = vmatprep.subr.bf16.mxu0 %v2892_v36  ;;  %2769 = vmatprep.subr.bf16.mxu1 %v2893_v37 }
 0x39e   :  { %2748 = vmatpush3.bf16.msra.mxu0 %v2894_v38  ;;  %2770 = vmatpush3.bf16.msra.mxu1 %v2895_v44 }
 0x39f   :  { %2749 = vmatprep.subr.bf16.mxu0 %v2896_v45  ;;  %2771 = vmatprep.subr.bf16.mxu1 %v2897_v30 }
 0x3a2   :  { %2750 = vmatpush3.bf16.msra.mxu0 %v2898_v46  ;;  %2772 = vmatpush3.bf16.msra.mxu1 %v2899_v50 }
 0x3a3   :  { %2751 = vmatprep.subr.bf16.mxu0 %v2900_v34  ;;  %2773 = vmatprep.subr.bf16.mxu1 %v2901_v52 }
 0x3a6   :  { %2752 = vmatpush3.bf16.msra.mxu0 %v2902_v53  ;;  %2774 = vmatpush3.bf16.msra.mxu1 %v2903_v54 }
 0x3a7   :  { %2753 = vmatprep.subr.bf16.mxu0 %v2904_v58  ;;  %2775 = vmatprep.subr.bf16.mxu1 %v2905_v60 }
 0x3aa   :  { %2754 = vmatpush3.bf16.msra.mxu0 %v2906_v61  ;;  %2776 = vmatpush3.bf16.msra.mxu1 %v2907_v42 }
 0x3ab   :  { %2755 = vmatprep.subr.bf16.mxu0 %v2908_v3  ;;  %2777 = vmatprep.subr.bf16.mxu1 %v2909_v5 }
 0x3ae   :  { %2756 = vmatpush3.bf16.msra.mxu0 %v2910_v62  ;;  %2778 = vmatpush3.bf16.msra.mxu1 %v2911_v6 }
 0x3b1   :  { %2364 = vmatmul.mubr.bf16.vlgmr.msra.gmra.mrb[20].mxu0 %v1728_v7  ;;  %2404 = vmatmul.mubr.bf16.vlgmr.msra.gmra.mrb[20].mxu1 %v1730_v11 }
 0x464   :  { %v2713_v13 = vpop.f32.mrb[16].mxu0  ;;  %v2735_v14 = vpop.f32.mrb[16].mxu1 }
 0x465   :  { %v2714_v47 = vpop.f32.mrb[17].mxu0  ;;  %v2736_v59 = vpop.f32.mrb[17].mxu1 }
 0x466   :  { %v2715_v4 = vadd.f32 %v2714_v47, %v2713_v13  ;;  %v2737_v57 = vadd.f32 %v2736_v59, %v2735_v14  ;;  %v2716_v1 = vpop.f32.mrb[18].mxu0  ;;  %v2738_v33 = vpop.f32.mrb[18].mxu1 }
 0x467   :  { %v2717_v48 = vpop.f32.mrb[19].mxu0  ;;  %v2739_v8 = vpop.f32.mrb[19].mxu1 }
 0x468   :  { %v2286_v10 = vadd.f32 %v2715_v4, %v2632_v15 }
 0x46a   :  { %v2326_v16 = vadd.f32 %v2737_v57, %v2286_v10 }
 0x484   :  { %v2757_v56 = vpop.f32.mrb[20].mxu0  ;;  %v2779_v27 = vpop.f32.mrb[20].mxu1 }
 0x485   :  { %v2758_v0 = vpop.f32.mrb[21].mxu0  ;;  %v2780_v39 = vpop.f32.mrb[21].mxu1 }
 0x486   :  { %v2759_v17 = vadd.f32 %v2758_v0, %v2757_v56  ;;  %v2781_v19 = vadd.f32 %v2780_v39, %v2779_v27  ;;  %v2760_v24 = vpop.f32.mrb[22].mxu0  ;;  %v2782_v25 = vpop.f32.mrb[22].mxu1 }
 0x487   :  { %v2761_v55 = vpop.f32.mrb[23].mxu0  ;;  %v2783_v12 = vpop.f32.mrb[23].mxu1 }
 0x488   :  { %v2366_v40 = vadd.f32 %v2759_v17, %v2326_v16 }
 0x48a   :  { %v2406_v63 = vadd.f32 %v2781_v19, %v2366_v40 }
 0x48c   :  { %v2411_v43 = vsel %vm191_vm1, %v2406_v63, -inf }
 0x48d   :  { %2412 = vmax.xlane.f32.xlu0 %v2411_v43 }
 0x51a   :  { %v2413_v31 = vpop.xlane.xlu0 %2412 }
 0x51b   :  { %v2414_v35 = vsub.f32 %v2406_v63, %v2413_v31 }
 0x51d   :  { %v2415_v41 = vmul.f32 1.442695, %v2414_v35 }
 0x51f   :  { %2952 = vpow2.f32 %v2415_v41 }
 0x529   :  { %v2953_v32 = vpop.eup %2952 }
 0x52a   :  { %v2417_v51 = vsel %vm191_vm1, %v2953_v32, 0.0 }
 0x52b   :  { %2418 = vadd.xlane.f32.xlu0 %v2417_v51 }
 0x5b8   :  { %v2419_v2 = vpop.xlane.xlu0 %2418 }
 0x5b9   :  { %2954 = vrcp.f32 %v2419_v2 }
 0x5c3   :  { %v2955_v9 = vpop.eup %2954 }
 0x5c4   :  { %v2421_v23 = vmul.f32 %v2955_v9, %v2953_v32 }
 0x5c6   :  { %2422 = vst [vmem:[#allocation12] sm:$0x3] %v2421_v23 }
 0x5c7   :  { %3067 = shalt.err (!%p3064_p13)
}
 0x5c8   :  { %s3068_s26 = scalar_lea.hbm %s3552_s8, 32 }
 0x5c9   :  { %p3069_p0 = scmp.ne.s32.totalorder %s3552_s8, %s3068_s26  ;;  %p3072_p1 = scmp.lt.u32.totalorder %s3068_s26, %s3552_s8 }
 0x5cb   :  { %p3074_p2 = pnand %p3072_p1, %p3069_p0 }
 0x5cd   :  { %3077 = shalt.err (!%p3074_p2)
}
 0x5ce   :  { %2432 = dma.vmem_to_hbm [thread:$0]  %s2430_s1, 32, %s3552_s8, [#allocation4]  }
 0x5cf   :  { %3086 = dma.done.wait [#allocation4], 32  }
 0x5d0   :  { %3087 = vsyncadd [#allocation4], 4294967264 }
 0x5d1   :  { %2436 = vsyncpa [#allocation3], 1 }
 0x5d2   :  { %2437 = vsyncpa [#allocation8], 1 }
 0x5d3   :  { %2438 = vsyncpa [#allocation11], 1 }
 0x5d4   :  { %2439 = vsyncpa [#allocation4], 1 }
 0x5d5   :  { %2440 = vsyncpa [#allocation5], 1 }

</bundles_post_ra>
